<compile_context>
chip_gen: v7x
topology: tpu7x:2x2x1
jax: 0.10.0
libtpu: 0.0.40
codegen_flags: <defaults>
</compile_context>

<pallas_src>
import math

import jax
import jax.numpy as jnp
from jax import lax
from jax.experimental import pallas as pl
from jax.experimental.pallas import tpu as pltpu


# --------------------------------------------------------------- helpers ----
def _pick_tile(dim, preferred, unit):
    """Largest multiple of `unit` that divides `dim`, capped at `preferred`.

    Falls back to the full dim, which is always a legal Pallas block size.
    """
    t = min(preferred, dim)
    t -= t % unit
    while t >= unit:
        if dim % t == 0:
            return t
        t -= unit
    return dim


# ---------------------------------------------------------- tiled matmul ----
def _matmul_nt_kernel(x_ref, w_ref, o_ref, acc_ref):
    # x_ref: (tm, tk), w_ref: (tn, tk), o_ref: (tm, tn), acc_ref: f32 (tm, tn)
    @pl.when(pl.program_id(2) == 0)
    def _init():
        acc_ref[...] = jnp.zeros_like(acc_ref)

    # Contract the shared last (K) dim -- no transposed tile is materialized,
    # and the inputs stay in their native dtype (bf16-ready) with f32 accum.
    acc_ref[...] += lax.dot_general(
        x_ref[...], w_ref[...],
        dimension_numbers=(((1,), (1,)), ((), ())),
        preferred_element_type=jnp.float32)

    @pl.when(pl.program_id(2) == pl.num_programs(2) - 1)
    def _store():
        o_ref[...] = acc_ref[...].astype(o_ref.dtype)


def pallas_linear(x, w, *, tm=256, tn=256, tk=512):
    """y = x @ w.T  (nn.Linear, bias=False).  x: (..., K), w: (N, K)."""
    K = x.shape[-1]
    N = w.shape[0]
    M = math.prod(x.shape[:-1])
    x2 = x.reshape(M, K)

    tm = _pick_tile(M, tm, 8)
    tn = _pick_tile(N, tn, 128)
    tk = _pick_tile(K, tk, 128)

    out = pl.pallas_call(
        _matmul_nt_kernel,
        out_shape=jax.ShapeDtypeStruct((M, N), x.dtype),
        grid_spec=pltpu.PrefetchScalarGridSpec(
            num_scalar_prefetch=0,
            grid=(M // tm, N // tn, K // tk),
            in_specs=[
                pl.BlockSpec((tm, tk), lambda i, j, k: (i, k)),
                pl.BlockSpec((tn, tk), lambda i, j, k: (j, k)),
            ],
            out_specs=pl.BlockSpec((tm, tn), lambda i, j, k: (i, j)),
            scratch_shapes=[pltpu.VMEM((tm, tn), jnp.float32)]),
        compiler_params=pltpu.CompilerParams(
            dimension_semantics=("parallel", "parallel", "arbitrary")),
    )(x2, w)
    return out.reshape(x.shape[:-1] + (N,))


# ------------------------------------------------------ flash attention -----
def _make_flash_kernel(scale, has_mask):
    """Online-softmax attention over all heads of one batch element."""

    def kernel(*refs):
        if has_mask:
            q_ref, k_ref, v_ref, mask_ref, o_ref, m_sc, l_sc, acc_sc = refs
        else:
            q_ref, k_ref, v_ref, o_ref, m_sc, l_sc, acc_sc = refs

        ki = pl.program_id(2)

        @pl.when(ki == 0)
        def _init():
            m_sc[...] = jnp.full_like(m_sc, -jnp.inf)
            l_sc[...] = jnp.zeros_like(l_sc)
            acc_sc[...] = jnp.zeros_like(acc_sc)

        # Blocks arrive as (tq|tkv, H, d); swap to head-leading for batched MXU
        # matmuls.  1/sqrt(d) is folded into q (and the mask tile) instead of
        # dividing the whole score matrix.
        q = jnp.swapaxes(q_ref[...] * scale, 0, 1)   # (H, tq, d)  native dtype
        k = jnp.swapaxes(k_ref[...], 0, 1)           # (H, tkv, d)
        v = jnp.swapaxes(v_ref[...], 0, 1)           # (H, tkv, d)

        s = jnp.einsum("hqd,hkd->hqk", q, k,
                       preferred_element_type=jnp.float32)      # (H, tq, tkv)
        if has_mask:
            # Module semantics: (mask + QK^T) / sqrt(d); one mask tile shared
            # by every head.
            s = s + (mask_ref[...].astype(jnp.float32) * scale)[None, :, :]

        m_prev = m_sc[...]                                        # (H, tq, 1)
        m_new = jnp.maximum(m_prev, jnp.max(s, axis=-1, keepdims=True))
        # Fully-masked rows have max == -inf; using 0 there makes exp() give 0
        # (not NaN), reproducing torch.nan_to_num(softmax(...)) -> zero rows.
        m_safe = jnp.where(m_new == -jnp.inf, 0.0, m_new)
        alpha = jnp.exp(m_prev - m_safe)
        p = jnp.exp(s - m_safe)                                   # f32
        l_sc[...] = alpha * l_sc[...] + jnp.sum(p, axis=-1, keepdims=True)
        acc_sc[...] = alpha * acc_sc[...] + jnp.einsum(
            "hqk,hkd->hqd", p.astype(v.dtype), v,
            preferred_element_type=jnp.float32)
        m_sc[...] = m_new

        @pl.when(ki == pl.num_programs(2) - 1)
        def _finalize():
            l = l_sc[...]
            l_safe = jnp.where(l == 0.0, 1.0, l)          # fully-masked rows -> 0
            inv = pl.reciprocal(l_safe, approx=True)      # EUP reciprocal
            inv = inv * (2.0 - l_safe * inv)              # one Newton step
            out = acc_sc[...] * inv                       # (H, tq, d)
            o_ref[...] = jnp.swapaxes(out, 0, 1).astype(o_ref.dtype)

    return kernel


def _flash_mha(q_src, k_src, v_src, attn_mask, *, n_heads, d_heads,
               q_sel, k_sel, v_sel, q_len, kv_len, tq=128, tkv=128):
    """q_src/k_src/v_src: (B, L, G, H, d) views of the projection outputs.

    q_sel/k_sel/v_sel pick the Q/K/V group along the G axis (head split is done
    purely by BlockSpec indexing; no HBM transposes).  Output: (B, S, H, d).
    """
    B = q_src.shape[0]
    S, SS = q_len, kv_len
    tq = _pick_tile(S, tq, 8)
    tkv = _pick_tile(SS, tkv, 128)
    has_mask = attn_mask is not None
    scale = 1.0 / float(d_heads) ** 0.5

    in_specs = [
        pl.BlockSpec((None, tq, None, n_heads, d_heads),
                     lambda b, qi, ki: (b, qi, q_sel, 0, 0)),
        pl.BlockSpec((None, tkv, None, n_heads, d_heads),
                     lambda b, qi, ki: (b, ki, k_sel, 0, 0)),
        pl.BlockSpec((None, tkv, None, n_heads, d_heads),
                     lambda b, qi, ki: (b, ki, v_sel, 0, 0)),
    ]
    args = [q_src, k_src, v_src]
    if has_mask:
        # Single (B, S, SS) mask; the index_map only uses the batch index, so
        # it is never replicated per head (no jnp.repeat, no H-fold DMA).
        in_specs.append(pl.BlockSpec((None, tq, tkv),
                                     lambda b, qi, ki: (b, qi, ki)))
        args.append(attn_mask)

    return pl.pallas_call(
        _make_flash_kernel(scale, has_mask),
        out_shape=jax.ShapeDtypeStruct((B, S, n_heads, d_heads), q_src.dtype),
        grid_spec=pltpu.PrefetchScalarGridSpec(
            num_scalar_prefetch=0,
            grid=(B, S // tq, SS // tkv),
            in_specs=in_specs,
            out_specs=pl.BlockSpec((None, tq, n_heads, d_heads),
                                   lambda b, qi, ki: (b, qi, 0, 0)),
            scratch_shapes=[
                pltpu.VMEM((n_heads, tq, 1), jnp.float32),        # running max
                pltpu.VMEM((n_heads, tq, 1), jnp.float32),        # running denom
                pltpu.VMEM((n_heads, tq, d_heads), jnp.float32),  # running numer
            ]),
        compiler_params=pltpu.CompilerParams(
            dimension_semantics=("parallel", "parallel", "arbitrary")),
    )(*args)


# --------------------------------------------------------- full forward -----
def multi_head_attention(x, params, n_heads, xa=None, attn_mask=None):
    """Mirrors MultiHeadAttention.forward for the tensor / None `xa` paths."""
    B, S, E = x.shape
    assert E % n_heads == 0, "d_model should be divisible by n_heads"
    d_heads = E // n_heads

    if xa is None:
        # Fused QKV projection: one pass over x with a (3E, E) weight.
        w_qkv = jnp.concatenate(
            [params["Wq"], params["Wk"], params["Wv"]], axis=0)
        qkv = pallas_linear(x, w_qkv)                        # (B, S, 3E)
        qkv = qkv.reshape(B, S, 3, n_heads, d_heads)         # free reshape
        SS = S
        q_src = k_src = v_src = qkv
        q_sel, k_sel, v_sel = 0, 1, 2
    else:
        assert xa.shape[0] == B and xa.shape[2] == E
        SS = xa.shape[1]
        q_src = pallas_linear(x, params["Wq"]).reshape(B, S, 1, n_heads, d_heads)
        w_kv = jnp.concatenate([params["Wk"], params["Wv"]], axis=0)
        kv = pallas_linear(xa, w_kv).reshape(B, SS, 2, n_heads, d_heads)
        k_src = v_src = kv
        q_sel, k_sel, v_sel = 0, 0, 1

    out = _flash_mha(q_src, k_src, v_src, attn_mask,
                     n_heads=n_heads, d_heads=d_heads,
                     q_sel=q_sel, k_sel=k_sel, v_sel=v_sel,
                     q_len=S, kv_len=SS)
    out = out.reshape(B, S, E)                               # free reshape
    return pallas_linear(out, params["Wo"])

# TODO(synk): the `type(xa) == dict` K/V-cache branch of forward() is host-side
# control flow; only the tensor / None xa paths are implemented here.


# ------------------------------------------------------------- reference ----
def reference_mha(x, params, n_heads, xa=None, attn_mask=None):
    """Pure-JAX transcription of the PyTorch module (f32)."""
    B, S, E = x.shape
    d = E // n_heads
    kv_in = x if xa is None else xa
    SS = kv_in.shape[1]
    Q = x @ params["Wq"].T
    K = kv_in @ params["Wk"].T
    V = kv_in @ params["Wv"].T

    def split(t, L):
        return (t.reshape(B, L, n_heads, d)
                 .transpose(0, 2, 1, 3)
                 .reshape(B * n_heads, L, d))

    Qh, Kh, Vh = split(Q, S), split(K, SS), split(V, SS)
    mask = (jnp.zeros((B * n_heads, S, SS), jnp.float32) if attn_mask is None
            else jnp.repeat(attn_mask, n_heads, axis=0))
    scores = (mask + jnp.einsum("bqd,bkd->bqk", Qh, Kh)) / (d ** 0.5)
    s_max = jnp.max(scores, axis=-1, keepdims=True)
    e = jnp.exp(scores - s_max)
    p = e / jnp.sum(e, axis=-1, keepdims=True)
    p = jnp.nan_to_num(p)                    # fully-masked rows -> 0, like torch
    o = jnp.einsum("bqk,bkd->bqd", p, Vh)
    o = o.reshape(B, n_heads, S, d).transpose(0, 2, 1, 3).reshape(B, S, E)
    return o @ params["Wo"].T


# ------------------------------------------------------------------ main ----
if __name__ == "__main__":
    B, S, E, H = 2, 8, 128, 4        # d_heads = 32
    SS = 16                          # cross-attention source length

    key = jax.random.PRNGKey(0)
    kx, ka, kq, kk, kv, ko, km = jax.random.split(key, 7)

    x = jax.random.normal(kx, (B, S, E), dtype=jnp.float32)
    xa = jax.random.normal(ka, (B, SS, E), dtype=jnp.float32)

    wscale = 1.0 / (E ** 0.5)
    params = {
        "Wq": jax.random.normal(kq, (E, E), dtype=jnp.float32) * wscale,
        "Wk": jax.random.normal(kk, (E, E), dtype=jnp.float32) * wscale,
        "Wv": jax.random.normal(kv, (E, E), dtype=jnp.float32) * wscale,
        "Wo": jax.random.normal(ko, (E, E), dtype=jnp.float32) * wscale,
    }

    mha = jax.jit(multi_head_attention, static_argnames=("n_heads",))

    # 1) self-attention, no mask
    out1 = jax.block_until_ready(mha(x, params, n_heads=H))
    ref1 = reference_mha(x, params, H)
    assert out1.shape == (B, S, E)
    assert jnp.allclose(out1, ref1, atol=1e-3, rtol=1e-3), "self-attn mismatch"

    # 2) self-attention with additive mask: causal + finite bias + one fully
    #    masked row (exercises the nan_to_num / zero-row path)
    neg_inf = float("-inf")
    causal = jnp.where(jnp.arange(S)[:, None] >= jnp.arange(S)[None, :],
                       0.0, neg_inf).astype(jnp.float32)
    bias = 0.3 * jax.random.normal(km, (B, S, S), dtype=jnp.float32)
    mask = causal[None, :, :] + bias
    mask = mask.at[1, 3, :].set(neg_inf)
    out2 = jax.block_until_ready(mha(x, params, n_heads=H, attn_mask=mask))
    ref2 = reference_mha(x, params, H, attn_mask=mask)
    assert jnp.allclose(out2, ref2, atol=1e-3, rtol=1e-3), "masked attn mismatch"

    # 3) cross-attention (xa with a different sequence length)
    out3 = jax.block_until_ready(mha(x, params, n_heads=H, xa=xa))
    ref3 = reference_mha(x, params, H, xa=xa)
    assert jnp.allclose(out3, ref3, atol=1e-3, rtol=1e-3), "cross-attn mismatch"

    print("KERNEL_OK")
</pallas_src>

<mosaic_0001>
module attributes {stable_mosaic.version = 11 : i64} {
  func.func @_matmul_nt_kernel(%arg0: i32, %arg1: i32, %arg2: i32, %arg3: memref<16x128xf32, #tpu.memory_space<vmem>>, %arg4: memref<128x128xf32, #tpu.memory_space<vmem>>, %arg5: memref<16x128xf32, #tpu.memory_space<vmem>>, %arg6: memref<16x128xf32, #tpu.memory_space<vmem>>) attributes {dimension_semantics = [#tpu.dimension_semantics<parallel>, #tpu.dimension_semantics<parallel>, #tpu.dimension_semantics<arbitrary>], iteration_bounds = array<i64: 1, 3, 1>, scalar_prefetch = 0 : i64, scratch_operands = 1 : i64, tpu.core_type = #tpu.core_type<tc>, window_params = [{transform_indices = @transform_0, window_bounds = array<i64: 16, 128>}, {transform_indices = @transform_1, window_bounds = array<i64: 128, 128>}, {transform_indices = @transform_2, window_bounds = array<i64: 16, 128>}]} {
    %c0_i32 = arith.constant 0 : i32
    %0 = arith.cmpi eq, %arg2, %c0_i32 : i32
    %1 = arith.extui %0 : i1 to i32
    %c0_i32_0 = arith.constant 0 : i32
    %2 = arith.cmpi ne, %1, %c0_i32_0 : i32
    scf.if %2 {
      %cst_10 = arith.constant 0.000000e+00 : f32
      %12 = vector.broadcast %cst_10 : f32 to vector<16x128xf32>
      %c0_11 = arith.constant 0 : index
      %c0_12 = arith.constant 0 : index
      %13 = vector.load %arg6[%c0_11, %c0_12] : memref<16x128xf32, #tpu.memory_space<vmem>>, vector<16x128xf32>
      tpu.vector_store %arg6[%c0_11, %c0_12], %12 {strides = array<i32>} : memref<16x128xf32, #tpu.memory_space<vmem>>, vector<16x128xf32>,
    } else {
    }
    %c0 = arith.constant 0 : index
    %c0_1 = arith.constant 0 : index
    %3 = vector.load %arg6[%c0, %c0_1] : memref<16x128xf32, #tpu.memory_space<vmem>>, vector<16x128xf32>
    %c0_2 = arith.constant 0 : index
    %c0_3 = arith.constant 0 : index
    %4 = vector.load %arg3[%c0_2, %c0_3] : memref<16x128xf32, #tpu.memory_space<vmem>>, vector<16x128xf32>
    %c0_4 = arith.constant 0 : index
    %c0_5 = arith.constant 0 : index
    %5 = vector.load %arg4[%c0_4, %c0_5] : memref<128x128xf32, #tpu.memory_space<vmem>>, vector<128x128xf32>
    %cst = arith.constant dense<0.000000e+00> : vector<16x128xf32>
    %6 = tpu.matmul %4, %5, %cst {dimension_numbers = #tpu.dot_dimension_numbers<[1], [1], [0], [0], [0, 0, 1, 0], [], []>} : vector<16x128xf32>, vector<128x128xf32>, vector<16x128xf32> -> vector<16x128xf32>
    %7 = arith.addf %3, %6 : vector<16x128xf32>
    %c0_6 = arith.constant 0 : index
    %c0_7 = arith.constant 0 : index
    %8 = vector.load %arg6[%c0_6, %c0_7] : memref<16x128xf32, #tpu.memory_space<vmem>>, vector<16x128xf32>
    tpu.vector_store %arg6[%c0_6, %c0_7], %7 {strides = array<i32>} : memref<16x128xf32, #tpu.memory_space<vmem>>, vector<16x128xf32>,
    %c0_i32_8 = arith.constant 0 : i32
    %9 = arith.cmpi eq, %arg2, %c0_i32_8 : i32
    %10 = arith.extui %9 : i1 to i32
    %c0_i32_9 = arith.constant 0 : i32
    %11 = arith.cmpi ne, %10, %c0_i32_9 : i32
    scf.if %11 {
      %c0_10 = arith.constant 0 : index
      %c0_11 = arith.constant 0 : index
      %12 = vector.load %arg6[%c0_10, %c0_11] : memref<16x128xf32, #tpu.memory_space<vmem>>, vector<16x128xf32>
      %c0_12 = arith.constant 0 : index
      %c0_13 = arith.constant 0 : index
      %13 = vector.load %arg5[%c0_12, %c0_13] : memref<16x128xf32, #tpu.memory_space<vmem>>, vector<16x128xf32>
      tpu.vector_store %arg5[%c0_12, %c0_13], %12 {strides = array<i32>} : memref<16x128xf32, #tpu.memory_space<vmem>>, vector<16x128xf32>,
    } else {
    }
    return
  }
  func.func @transform_0(%arg0: i32, %arg1: i32, %arg2: i32) -> (i32, i32) {
    %c0_i32 = arith.constant 0 : i32
    return %arg0, %arg2 : i32, i32
  }
  func.func @transform_1(%arg0: i32, %arg1: i32, %arg2: i32) -> (i32, i32) {
    %c0_i32 = arith.constant 0 : i32
    return %arg1, %arg2 : i32, i32
  }
  func.func @transform_2(%arg0: i32, %arg1: i32, %arg2: i32) -> (i32, i32) {
    %c0_i32 = arith.constant 0 : i32
    return %arg0, %arg1 : i32, i32
  }
}

module attributes {stable_mosaic.version = 11 : i64} {
  func.func @kernel(%arg0: i32, %arg1: i32, %arg2: i32, %arg3: memref<1x8x1x4x32xf32, #tpu.memory_space<vmem>>, %arg4: memref<1x8x1x4x32xf32, #tpu.memory_space<vmem>>, %arg5: memref<1x8x1x4x32xf32, #tpu.memory_space<vmem>>, %arg6: memref<1x8x4x32xf32, #tpu.memory_space<vmem>>, %arg7: memref<4x8x1xf32, #tpu.memory_space<vmem>>, %arg8: memref<4x8x1xf32, #tpu.memory_space<vmem>>, %arg9: memref<4x8x32xf32, #tpu.memory_space<vmem>>) attributes {dimension_semantics = [#tpu.dimension_semantics<parallel>, #tpu.dimension_semantics<parallel>, #tpu.dimension_semantics<arbitrary>], iteration_bounds = array<i64: 2, 1, 1>, scalar_prefetch = 0 : i64, scratch_operands = 3 : i64, tpu.core_type = #tpu.core_type<tc>, window_params = [{transform_indices = @transform_0, window_bounds = array<i64: 1, 8, 1, 4, 32>}, {transform_indices = @transform_1, window_bounds = array<i64: 1, 8, 1, 4, 32>}, {transform_indices = @transform_2, window_bounds = array<i64: 1, 8, 1, 4, 32>}, {transform_indices = @transform_3, window_bounds = array<i64: 1, 8, 4, 32>}]} {
    %c0_i32 = arith.constant 0 : i32
    %0 = arith.cmpi eq, %arg2, %c0_i32 : i32
    %1 = arith.extui %0 : i1 to i32
    %c0_i32_0 = arith.constant 0 : i32
    %2 = arith.cmpi ne, %1, %c0_i32_0 : i32
    scf.if %2 {
      %cst_41 = arith.constant 0xFF800000 : f32
      %44 = vector.broadcast %cst_41 : f32 to vector<4x8x1xf32>
      %c0_42 = arith.constant 0 : index
      %c0_43 = arith.constant 0 : index
      %c0_44 = arith.constant 0 : index
      %45 = vector.load %arg7[%c0_42, %c0_43, %c0_44] : memref<4x8x1xf32, #tpu.memory_space<vmem>>, vector<4x8x1xf32>
      tpu.vector_store %arg7[%c0_42, %c0_43, %c0_44], %44 {strides = array<i32>} : memref<4x8x1xf32, #tpu.memory_space<vmem>>, vector<4x8x1xf32>,
      %cst_45 = arith.constant 0.000000e+00 : f32
      %46 = vector.broadcast %cst_45 : f32 to vector<4x8x1xf32>
      %c0_46 = arith.constant 0 : index
      %c0_47 = arith.constant 0 : index
      %c0_48 = arith.constant 0 : index
      %47 = vector.load %arg8[%c0_46, %c0_47, %c0_48] : memref<4x8x1xf32, #tpu.memory_space<vmem>>, vector<4x8x1xf32>
      tpu.vector_store %arg8[%c0_46, %c0_47, %c0_48], %46 {strides = array<i32>} : memref<4x8x1xf32, #tpu.memory_space<vmem>>, vector<4x8x1xf32>,
      %cst_49 = arith.constant 0.000000e+00 : f32
      %48 = vector.broadcast %cst_49 : f32 to vector<4x8x32xf32>
      %c0_50 = arith.constant 0 : index
      %c0_51 = arith.constant 0 : index
      %c0_52 = arith.constant 0 : index
      %49 = vector.load %arg9[%c0_50, %c0_51, %c0_52] : memref<4x8x32xf32, #tpu.memory_space<vmem>>, vector<4x8x32xf32>
      tpu.vector_store %arg9[%c0_50, %c0_51, %c0_52], %48 {strides = array<i32>} : memref<4x8x32xf32, #tpu.memory_space<vmem>>, vector<4x8x32xf32>,
    } else {
    }
    %c0 = arith.constant 0 : index
    %c0_1 = arith.constant 0 : index
    %c0_2 = arith.constant 0 : index
    %c0_3 = arith.constant 0 : index
    %c0_4 = arith.constant 0 : index
    %3 = vector.load %arg3[%c0, %c0_1, %c0_2, %c0_3, %c0_4] : memref<1x8x1x4x32xf32, #tpu.memory_space<vmem>>, vector<1x8x1x4x32xf32>
    %4 = vector.shape_cast %3 : vector<1x8x1x4x32xf32> to vector<8x4x32xf32>
    %cst = arith.constant 0.176776692 : f32
    %5 = vector.broadcast %cst : f32 to vector<8x4x32xf32>
    %6 = arith.mulf %4, %5 : vector<8x4x32xf32>
    %7 = tpu.transpose %6, [1, 0, 2] : vector<8x4x32xf32> -> vector<4x8x32xf32>
    %c0_5 = arith.constant 0 : index
    %c0_6 = arith.constant 0 : index
    %c0_7 = arith.constant 0 : index
    %c0_8 = arith.constant 0 : index
    %c0_9 = arith.constant 0 : index
    %8 = vector.load %arg4[%c0_5, %c0_6, %c0_7, %c0_8, %c0_9] : memref<1x8x1x4x32xf32, #tpu.memory_space<vmem>>, vector<1x8x1x4x32xf32>
    %9 = vector.shape_cast %8 : vector<1x8x1x4x32xf32> to vector<8x4x32xf32>
    %10 = tpu.transpose %9, [1, 0, 2] : vector<8x4x32xf32> -> vector<4x8x32xf32>
    %c0_10 = arith.constant 0 : index
    %c0_11 = arith.constant 0 : index
    %c0_12 = arith.constant 0 : index
    %c0_13 = arith.constant 0 : index
    %c0_14 = arith.constant 0 : index
    %11 = vector.load %arg5[%c0_10, %c0_11, %c0_12, %c0_13, %c0_14] : memref<1x8x1x4x32xf32, #tpu.memory_space<vmem>>, vector<1x8x1x4x32xf32>
    %12 = vector.shape_cast %11 : vector<1x8x1x4x32xf32> to vector<8x4x32xf32>
    %13 = tpu.transpose %12, [1, 0, 2] : vector<8x4x32xf32> -> vector<4x8x32xf32>
    "tpu.trace_start"() <{level = 10 : i32, message = "hqd,hkd->hqk"}> : () -> ()
    %cst_15 = arith.constant dense<0.000000e+00> : vector<4x8x8xf32>
    %14 = tpu.matmul %7, %10, %cst_15 {dimension_numbers = #tpu.dot_dimension_numbers<[2], [2], [1], [1], [0, 0, 0, 1, 1, 1], [0], [0]>} : vector<4x8x32xf32>, vector<4x8x32xf32>, vector<4x8x8xf32> -> vector<4x8x8xf32>
    "tpu.trace_stop"() : () -> ()
    %c0_16 = arith.constant 0 : index
    %c0_17 = arith.constant 0 : index
    %c0_18 = arith.constant 0 : index
    %15 = vector.load %arg7[%c0_16, %c0_17, %c0_18] : memref<4x8x1xf32, #tpu.memory_space<vmem>>, vector<4x8x1xf32>
    %cst_19 = arith.constant dense<0xFF800000> : vector<4x8xf32>
    %16 = vector.multi_reduction <maximumf>, %14, %cst_19 [2] : vector<4x8x8xf32> to vector<4x8xf32>
    %17 = vector.shape_cast %16 : vector<4x8xf32> to vector<4x8x1xf32>
    %18 = arith.maximumf %15, %17 : vector<4x8x1xf32>
    %cst_20 = arith.constant 0xFF800000 : f32
    %19 = vector.broadcast %cst_20 : f32 to vector<4x8x1xf32>
    %20 = arith.cmpf oeq, %18, %19 : vector<4x8x1xf32>
    %cst_21 = arith.constant 0.000000e+00 : f32
    %21 = vector.broadcast %cst_21 : f32 to vector<4x8x1xf32>
    %22 = arith.select %20, %21, %18 : vector<4x8x1xi1>, vector<4x8x1xf32>
    %23 = arith.subf %15, %22 : vector<4x8x1xf32>
    %24 = math.exp %23 : vector<4x8x1xf32>
    %25 = vector.broadcast %22 : vector<4x8x1xf32> to vector<4x8x8xf32>
    %26 = arith.subf %14, %25 : vector<4x8x8xf32>
    %27 = math.exp %26 : vector<4x8x8xf32>
    %c0_22 = arith.constant 0 : index
    %c0_23 = arith.constant 0 : index
    %c0_24 = arith.constant 0 : index
    %28 = vector.load %arg8[%c0_22, %c0_23, %c0_24] : memref<4x8x1xf32, #tpu.memory_space<vmem>>, vector<4x8x1xf32>
    %29 = arith.mulf %24, %28 : vector<4x8x1xf32>
    %cst_25 = arith.constant dense<0.000000e+00> : vector<4x8xf32>
    %30 = vector.multi_reduction <add>, %27, %cst_25 [2] : vector<4x8x8xf32> to vector<4x8xf32>
    %31 = vector.shape_cast %30 : vector<4x8xf32> to vector<4x8x1xf32>
    %32 = arith.addf %29, %31 : vector<4x8x1xf32>
    %c0_26 = arith.constant 0 : index
    %c0_27 = arith.constant 0 : index
    %c0_28 = arith.constant 0 : index
    %33 = vector.load %arg8[%c0_26, %c0_27, %c0_28] : memref<4x8x1xf32, #tpu.memory_space<vmem>>, vector<4x8x1xf32>
    tpu.vector_store %arg8[%c0_26, %c0_27, %c0_28], %32 {strides = array<i32>} : memref<4x8x1xf32, #tpu.memory_space<vmem>>, vector<4x8x1xf32>,
    %c0_29 = arith.constant 0 : index
    %c0_30 = arith.constant 0 : index
    %c0_31 = arith.constant 0 : index
    %34 = vector.load %arg9[%c0_29, %c0_30, %c0_31] : memref<4x8x32xf32, #tpu.memory_space<vmem>>, vector<4x8x32xf32>
    %35 = vector.broadcast %24 : vector<4x8x1xf32> to vector<4x8x32xf32>
    %36 = arith.mulf %35, %34 : vector<4x8x32xf32>
    "tpu.trace_start"() <{level = 10 : i32, message = "hqk,hkd->hqd"}> : () -> ()
    %cst_32 = arith.constant dense<0.000000e+00> : vector<4x8x32xf32>
    %37 = tpu.matmul %27, %13, %cst_32 {dimension_numbers = #tpu.dot_dimension_numbers<[2], [1], [1], [2], [0, 0, 0, 1, 1, 2], [0], [0]>} : vector<4x8x8xf32>, vector<4x8x32xf32>, vector<4x8x32xf32> -> vector<4x8x32xf32>
    "tpu.trace_stop"() : () -> ()
    %38 = arith.addf %36, %37 : vector<4x8x32xf32>
    %c0_33 = arith.constant 0 : index
    %c0_34 = arith.constant 0 : index
    %c0_35 = arith.constant 0 : index
    %39 = vector.load %arg9[%c0_33, %c0_34, %c0_35] : memref<4x8x32xf32, #tpu.memory_space<vmem>>, vector<4x8x32xf32>
    tpu.vector_store %arg9[%c0_33, %c0_34, %c0_35], %38 {strides = array<i32>} : memref<4x8x32xf32, #tpu.memory_space<vmem>>, vector<4x8x32xf32>,
    %c0_36 = arith.constant 0 : index
    %c0_37 = arith.constant 0 : index
    %c0_38 = arith.constant 0 : index
    %40 = vector.load %arg7[%c0_36, %c0_37, %c0_38] : memref<4x8x1xf32, #tpu.memory_space<vmem>>, vector<4x8x1xf32>
    tpu.vector_store %arg7[%c0_36, %c0_37, %c0_38], %18 {strides = array<i32>} : memref<4x8x1xf32, #tpu.memory_space<vmem>>, vector<4x8x1xf32>,
    %c0_i32_39 = arith.constant 0 : i32
    %41 = arith.cmpi eq, %arg2, %c0_i32_39 : i32
    %42 = arith.extui %41 : i1 to i32
    %c0_i32_40 = arith.constant 0 : i32
    %43 = arith.cmpi ne, %42, %c0_i32_40 : i32
    scf.if %43 {
      %c0_41 = arith.constant 0 : index
      %c0_42 = arith.constant 0 : index
      %c0_43 = arith.constant 0 : index
      %44 = vector.load %arg8[%c0_41, %c0_42, %c0_43] : memref<4x8x1xf32, #tpu.memory_space<vmem>>, vector<4x8x1xf32>
      %cst_44 = arith.constant 0.000000e+00 : f32
      %45 = vector.broadcast %cst_44 : f32 to vector<4x8x1xf32>
      %46 = arith.cmpf oeq, %44, %45 : vector<4x8x1xf32>
      %cst_45 = arith.constant 1.000000e+00 : f32
      %47 = vector.broadcast %cst_45 : f32 to vector<4x8x1xf32>
      %48 = arith.select %46, %47, %44 : vector<4x8x1xi1>, vector<4x8x1xf32>
      %49 = tpu.reciprocal %48 {approx = true} : vector<4x8x1xf32> -> vector<4x8x1xf32>
      %50 = arith.mulf %48, %49 : vector<4x8x1xf32>
      %cst_46 = arith.constant 2.000000e+00 : f32
      %51 = vector.broadcast %cst_46 : f32 to vector<4x8x1xf32>
      %52 = arith.subf %51, %50 : vector<4x8x1xf32>
      %53 = arith.mulf %49, %52 : vector<4x8x1xf32>
      %c0_47 = arith.constant 0 : index
      %c0_48 = arith.constant 0 : index
      %c0_49 = arith.constant 0 : index
      %54 = vector.load %arg9[%c0_47, %c0_48, %c0_49] : memref<4x8x32xf32, #tpu.memory_space<vmem>>, vector<4x8x32xf32>
      %55 = vector.broadcast %53 : vector<4x8x1xf32> to vector<4x8x32xf32>
      %56 = arith.mulf %54, %55 : vector<4x8x32xf32>
      %57 = tpu.transpose %56, [1, 0, 2] : vector<4x8x32xf32> -> vector<8x4x32xf32>
      %c0_50 = arith.constant 0 : index
      %c0_51 = arith.constant 0 : index
      %c0_52 = arith.constant 0 : index
      %c0_53 = arith.constant 0 : index
      %58 = vector.load %arg6[%c0_50, %c0_51, %c0_52, %c0_53] : memref<1x8x4x32xf32, #tpu.memory_space<vmem>>, vector<1x8x4x32xf32>
      %59 = vector.shape_cast %58 : vector<1x8x4x32xf32> to vector<8x4x32xf32>
      %60 = vector.shape_cast %57 : vector<8x4x32xf32> to vector<1x8x4x32xf32>
      tpu.vector_store %arg6[%c0_50, %c0_51, %c0_52, %c0_53], %60 {strides = array<i32>} : memref<1x8x4x32xf32, #tpu.memory_space<vmem>>, vector<1x8x4x32xf32>,
    } else {
    }
    return
  }
  func.func @transform_0(%arg0: i32, %arg1: i32, %arg2: i32) -> (i32, i32, i32, i32, i32) {
    %c0_i32 = arith.constant 0 : i32
    %c0_i32_0 = arith.constant 0 : i32
    %c0_i32_1 = arith.constant 0 : i32
    %c0_i32_2 = arith.constant 0 : i32
    return %arg0, %arg1, %c0_i32, %c0_i32_0, %c0_i32_1 : i32, i32, i32, i32, i32
  }
  func.func @transform_1(%arg0: i32, %arg1: i32, %arg2: i32) -> (i32, i32, i32, i32, i32) {
    %c1_i32 = arith.constant 1 : i32
    %c0_i32 = arith.constant 0 : i32
    %c0_i32_0 = arith.constant 0 : i32
    %c0_i32_1 = arith.constant 0 : i32
    return %arg0, %arg2, %c1_i32, %c0_i32, %c0_i32_0 : i32, i32, i32, i32, i32
  }
  func.func @transform_2(%arg0: i32, %arg1: i32, %arg2: i32) -> (i32, i32, i32, i32, i32) {
    %c2_i32 = arith.constant 2 : i32
    %c0_i32 = arith.constant 0 : i32
    %c0_i32_0 = arith.constant 0 : i32
    %c0_i32_1 = arith.constant 0 : i32
    return %arg0, %arg2, %c2_i32, %c0_i32, %c0_i32_0 : i32, i32, i32, i32, i32
  }
  func.func @transform_3(%arg0: i32, %arg1: i32, %arg2: i32) -> (i32, i32, i32, i32) {
    %c0_i32 = arith.constant 0 : i32
    %c0_i32_0 = arith.constant 0 : i32
    %c0_i32_1 = arith.constant 0 : i32
    return %arg0, %arg1, %c0_i32, %c0_i32_0 : i32, i32, i32, i32
  }
}

module attributes {stable_mosaic.version = 11 : i64} {
  func.func @_matmul_nt_kernel(%arg0: i32, %arg1: i32, %arg2: i32, %arg3: memref<16x128xf32, #tpu.memory_space<vmem>>, %arg4: memref<128x128xf32, #tpu.memory_space<vmem>>, %arg5: memref<16x128xf32, #tpu.memory_space<vmem>>, %arg6: memref<16x128xf32, #tpu.memory_space<vmem>>) attributes {dimension_semantics = [#tpu.dimension_semantics<parallel>, #tpu.dimension_semantics<parallel>, #tpu.dimension_semantics<arbitrary>], iteration_bounds = array<i64: 1, 1, 1>, scalar_prefetch = 0 : i64, scratch_operands = 1 : i64, tpu.core_type = #tpu.core_type<tc>, window_params = [{transform_indices = @transform_0, window_bounds = array<i64: 16, 128>}, {transform_indices = @transform_1, window_bounds = array<i64: 128, 128>}, {transform_indices = @transform_2, window_bounds = array<i64: 16, 128>}]} {
    %c0_i32 = arith.constant 0 : i32
    %0 = arith.cmpi eq, %arg2, %c0_i32 : i32
    %1 = arith.extui %0 : i1 to i32
    %c0_i32_0 = arith.constant 0 : i32
    %2 = arith.cmpi ne, %1, %c0_i32_0 : i32
    scf.if %2 {
      %cst_10 = arith.constant 0.000000e+00 : f32
      %12 = vector.broadcast %cst_10 : f32 to vector<16x128xf32>
      %c0_11 = arith.constant 0 : index
      %c0_12 = arith.constant 0 : index
      %13 = vector.load %arg6[%c0_11, %c0_12] : memref<16x128xf32, #tpu.memory_space<vmem>>, vector<16x128xf32>
      tpu.vector_store %arg6[%c0_11, %c0_12], %12 {strides = array<i32>} : memref<16x128xf32, #tpu.memory_space<vmem>>, vector<16x128xf32>,
    } else {
    }
    %c0 = arith.constant 0 : index
    %c0_1 = arith.constant 0 : index
    %3 = vector.load %arg6[%c0, %c0_1] : memref<16x128xf32, #tpu.memory_space<vmem>>, vector<16x128xf32>
    %c0_2 = arith.constant 0 : index
    %c0_3 = arith.constant 0 : index
    %4 = vector.load %arg3[%c0_2, %c0_3] : memref<16x128xf32, #tpu.memory_space<vmem>>, vector<16x128xf32>
    %c0_4 = arith.constant 0 : index
    %c0_5 = arith.constant 0 : index
    %5 = vector.load %arg4[%c0_4, %c0_5] : memref<128x128xf32, #tpu.memory_space<vmem>>, vector<128x128xf32>
    %cst = arith.constant dense<0.000000e+00> : vector<16x128xf32>
    %6 = tpu.matmul %4, %5, %cst {dimension_numbers = #tpu.dot_dimension_numbers<[1], [1], [0], [0], [0, 0, 1, 0], [], []>} : vector<16x128xf32>, vector<128x128xf32>, vector<16x128xf32> -> vector<16x128xf32>
    %7 = arith.addf %3, %6 : vector<16x128xf32>
    %c0_6 = arith.constant 0 : index
    %c0_7 = arith.constant 0 : index
    %8 = vector.load %arg6[%c0_6, %c0_7] : memref<16x128xf32, #tpu.memory_space<vmem>>, vector<16x128xf32>
    tpu.vector_store %arg6[%c0_6, %c0_7], %7 {strides = array<i32>} : memref<16x128xf32, #tpu.memory_space<vmem>>, vector<16x128xf32>,
    %c0_i32_8 = arith.constant 0 : i32
    %9 = arith.cmpi eq, %arg2, %c0_i32_8 : i32
    %10 = arith.extui %9 : i1 to i32
    %c0_i32_9 = arith.constant 0 : i32
    %11 = arith.cmpi ne, %10, %c0_i32_9 : i32
    scf.if %11 {
      %c0_10 = arith.constant 0 : index
      %c0_11 = arith.constant 0 : index
      %12 = vector.load %arg6[%c0_10, %c0_11] : memref<16x128xf32, #tpu.memory_space<vmem>>, vector<16x128xf32>
      %c0_12 = arith.constant 0 : index
      %c0_13 = arith.constant 0 : index
      %13 = vector.load %arg5[%c0_12, %c0_13] : memref<16x128xf32, #tpu.memory_space<vmem>>, vector<16x128xf32>
      tpu.vector_store %arg5[%c0_12, %c0_13], %12 {strides = array<i32>} : memref<16x128xf32, #tpu.memory_space<vmem>>, vector<16x128xf32>,
    } else {
    }
    return
  }
  func.func @transform_0(%arg0: i32, %arg1: i32, %arg2: i32) -> (i32, i32) {
    %c0_i32 = arith.constant 0 : i32
    return %arg0, %arg2 : i32, i32
  }
  func.func @transform_1(%arg0: i32, %arg1: i32, %arg2: i32) -> (i32, i32) {
    %c0_i32 = arith.constant 0 : i32
    return %arg1, %arg2 : i32, i32
  }
  func.func @transform_2(%arg0: i32, %arg1: i32, %arg2: i32) -> (i32, i32) {
    %c0_i32 = arith.constant 0 : i32
    return %arg0, %arg1 : i32, i32
  }
}

</mosaic_0001>

<bundles_post_ra>
// kernel: multi_head_attention.3
= control target key start
LH: loop header
LB: loop body
LE: loop exit
PB: predicated region body
PF: predicated region fallthrough
CT: control target
= control target key end

     0   :  { %s644_s9 = smov 0   ;;  %s646_s10 = smov 0   ;;  %s737_s0 = inlined_call_operand.vmem [shape: f32[16,128], index: 0, kind: input, shape index: {}]   ;;  %s738_s1 = inlined_call_operand.vmem [shape: f32[384,128], index: 1, kind: input, shape index: {}]   ;;  %s739_s2 = inlined_call_operand.vmem [shape: f32[16,384], index: 2, kind: output, shape index: {}]  }
   0x1   :  { %s648_s11 = smov 0   ;;  %s650_s12 = smov 0  }
   0x2   :  { %s652_s13 = smov 0  }
   0x3 LB: > { %s451_s14 = sadd.s32 4294967295, %s627_s13   ;;  %s27_s15 = sadd.s32 1, %s623_s12  ;;  %s627_s13 = sphi %s652_s13, %s12_s13   ;;  %s623_s12 = sphi %s650_s12, %s744_s12   ;;  %s619_s11 = sphi %s648_s11, %s743_s11   ;;  %s615_s10 = sphi %s646_s10, %s742_s10   ;;  %s611_s9 = sphi %s644_s9, %s741_s9  }
   0x4   : > { %p29_p0 = scmp.ge.s32.totalorder %s27_s15, 3  ;;  %s96_s16 = sadd.s32 1, %s615_s10 }
   0x5   : > { %p106_p1 = scmp.ne.s32.totalorder %s615_s10, %s611_s9  ;;  %p107_p2 = scmp.eq.s32.totalorder %s451_s14, 2 }
   0x6   : > { %s746_s15 = smov (%p29_p0, %s27_s15), 0  ;;  %p456_p4 = scmp.ge.s32.totalorder %s627_s13, 1 }
   0x7   : > { %p676_p3 = por %p107_p2, %p106_p1  ;;  %s92_s18 = ssub.s32 %s623_s12, %s746_s15 }
   0x8   : > { %p155_p5 = scmp.lt.s32.totalorder %s627_s13, 4  ;;  %p94_p6 = scmp.eq.s32.totalorder %s92_s18, 0 }
   0xa   : > { %p156_p7 = pnand %p456_p4, %p155_p5 }
   0xb   : > { %s685_s19 = scalar_select %p94_p6, %s615_s10, %s96_s16  }
   0xc   : > { %159 = sbr.rel (%p156_p7) target bundleno = 311 (0x137), region = 28  ;;  %s458_s20 = sshll.u32 (!%p156_p7), %s619_s11, 4  ;;  %v214_v0 = vld [vmem:[%s737_s0] sm:$0xff] (!%p156_p7)  ;;  %v215_v25 = vld [vmem:[%s737_s0 + $0x8] sm:$0xff] (!%p156_p7) }
   0xd   : > { %p197_p8 = scmp.lt.s32.totalorder (!%p156_p7), %s458_s20, 47  ;;  %514 = vmatprep.mubr.f32.mxu0 (!%p156_p7), %v214_v0  ;;  %s184_s29 = sand.u32 (!%p156_p7), 1, %s611_s9  }
   0xe   : > { %s457_s30 = sshll.u32 (!%p156_p7), %s184_s29, 4 }
   0xf   : > { %s186_s3 = scalar_lea.vmem (!%p156_p7), [#allocation3], %s457_s30 }
  0x13   : > { %s748_s20 = smov (!%p197_p8, %s458_s20), 47  ;;  %s461_s4 = sshll.u32 (%p676_p3), %s619_s11, 3 }
  0x14   : > { %s459_s23 = sshll.u32 %s748_s20, 3  ;;  %s329_s7 = scalar_lea.vmem (%p676_p3), %s739_s2, %s461_s4 }
  0x15   : > { %s694_s26 = scalar_lea.vmem %s738_s1, %s459_s23 }
  0x16   : > { %v216_v1 = vld [vmem:[%s694_s26] sm:$0xff]  ;;  %v217_v2 = vld [vmem:[%s694_s26 + $0x8] sm:$0xff]  ;;  %v218_v3 = vld [vmem:[%s694_s26 + $0x10] sm:$0xff] }
  0x17   : > { %v517_v4 = vpack.c.bf16 %v217_v2, %v216_v1  ;;  %v219_v5 = vld [vmem:[%s694_s26 + $0x18] sm:$0xff]  ;;  %v220_v7 = vld [vmem:[%s694_s26 + $0x20] sm:$0xff]  ;;  %v221_v8 = vld [vmem:[%s694_s26 + $0x28] sm:$0xff] }
  0x18   : > { %v521_v6 = vpack.c.bf16 %v219_v5, %v218_v3  ;;  %v525_v9 = vpack.c.bf16 %v221_v8, %v220_v7  ;;  %v222_v10 = vld [vmem:[%s694_s26 + $0x30] sm:$0xff]  ;;  %v223_v11 = vld [vmem:[%s694_s26 + $0x38] sm:$0xff]  ;;  %v224_v13 = vld [vmem:[%s694_s26 + $0x40] sm:$0xff] }
  0x19   : > { %518 = vmatprep.subr.bf16.mxu0 %v517_v4  ;;  %v529_v12 = vpack.c.bf16 %v223_v11, %v222_v10  ;;  %v225_v14 = vld [vmem:[%s694_s26 + $0x48] sm:$0xff]  ;;  %v226_v16 = vld [vmem:[%s694_s26 + $0x50] sm:$0xff]  ;;  %v227_v17 = vld [vmem:[%s694_s26 + $0x58] sm:$0xff] }
  0x1a   : > { %520 = vmatpush3.bf16.xpose.msra.mxu0 %v517_v4  ;;  %v533_v15 = vpack.c.bf16 %v225_v14, %v224_v13  ;;  %v537_v18 = vpack.c.bf16 %v227_v17, %v226_v16  ;;  %v228_v19 = vld [vmem:[%s694_s26 + $0x60] sm:$0xff]  ;;  %v229_v20 = vld [vmem:[%s694_s26 + $0x68] sm:$0xff]  ;;  %v230_v22 = vld [vmem:[%s694_s26 + $0x70] sm:$0xff] }
  0x1b   : > { %522 = vmatprep.subr.bf16.mxu0 %v521_v6  ;;  %v541_v21 = vpack.c.bf16 %v229_v20, %v228_v19  ;;  %v231_v23 = vld [vmem:[%s694_s26 + $0x78] sm:$0xff] }
  0x1c   : > { %v545_v24 = vpack.c.bf16 %v231_v23, %v230_v22 }
  0x22   : > { %524 = vmatpush3.bf16.xpose.msra.mxu0 %v521_v6 }
  0x23   : > { %526 = vmatprep.subr.bf16.mxu0 %v525_v9 }
  0x2a   : > { %528 = vmatpush3.bf16.xpose.msra.mxu0 %v525_v9 }
  0x2b   : > { %530 = vmatprep.subr.bf16.mxu0 %v529_v12 }
  0x32   : > { %532 = vmatpush3.bf16.xpose.msra.mxu0 %v529_v12 }
  0x33   : > { %534 = vmatprep.subr.bf16.mxu0 %v533_v15 }
  0x3a   : > { %536 = vmatpush3.bf16.xpose.msra.mxu0 %v533_v15 }
  0x3b   : > { %538 = vmatprep.subr.bf16.mxu0 %v537_v18 }
  0x42   : > { %540 = vmatpush3.bf16.xpose.msra.mxu0 %v537_v18 }
  0x43   : > { %542 = vmatprep.subr.bf16.mxu0 %v541_v21 }
  0x4a   : > { %544 = vmatpush3.bf16.xpose.msra.mxu0 %v541_v21 }
  0x4b   : > { %546 = vmatprep.subr.bf16.mxu0 %v545_v24 }
  0x52   : > { %548 = vmatpush3.bf16.xpose.msra.mxu0 %v545_v24 }
  0x59   : > { %515 = vmatmul.mubr.f32.vlgmr.msra.gmra.mrb[0].mxu0 %v215_v25 }
 0x128   : > { %324 = sbr.rel (!%p676_p3) target bundleno = 311 (0x137), region = 40 }
 0x12c   : > { %v516_v26 = vpop.f32.mrb[0].mxu0 }
 0x12d   : > { %317 = vst [vmem:[%s186_s3 + $0x8] sm:$0xff] %v516_v26  ;;  %v298_v27 = vpop.f32.mrb[1].mxu0 }
 0x12e   : > { %316 = vst [vmem:[%s186_s3] sm:$0xff] %v298_v27 }
 0x134   : > { %v361_v29 = vld [vmem:[%s186_s3 + $0x8] sm:$0xff] }
 0x135   : > { %v359_v28 = vld [vmem:[%s186_s3] sm:$0xff]  ;;  %362 = vst [vmem:[%s329_s7 + $0x18] sm:$0xff] %v361_v29 }
 0x136   : > { %360 = vst [vmem:[%s329_s7] sm:$0xff] %v359_v28 }
 0x137 PF: > { %s12_s13 = sadd.s32 1, %s627_s13   ;;  %s741_s9 = smov %s615_s10 }
 0x138   : > { %p9_p9 = scmp.ge.s32.totalorder %s12_s13, 5   ;;  %s742_s10 = smov %s685_s19 }
 0x139   : > { %s743_s11 = smov %s623_s12  ;;  %s744_s12 = smov %s746_s15 }
 0x13a   :  { %11 = sbr.rel (!%p9_p9) target bundleno = 3 (0x3), region = 107 }

// kernel: multi_head_attention.5
= control target key start
LH: loop header
LB: loop body
LE: loop exit
PB: predicated region body
PF: predicated region fallthrough
CT: control target
= control target key end

     0   :  { %s336_s0 = inlined_call_operand.vmem [shape: f32[16,128], index: 0, kind: input, shape index: {}]   ;;  %s337_s1 = inlined_call_operand.vmem [shape: f32[128,128], index: 1, kind: input, shape index: {}]   ;;  %s338_s2 = inlined_call_operand.hbm [shape: f32[16,128], index: 2, kind: output, shape index: {}]  }
   0x1   :  { %v22_v0 = vld [vmem:[%s337_s1] sm:$0xff]  ;;  %v23_v1 = vld [vmem:[%s337_s1 + $0x8] sm:$0xff]  ;;  %v24_v2 = vld [vmem:[%s337_s1 + $0x10] sm:$0xff] }
   0x2   :  { %v193_v3 = vpack.c.bf16 %v23_v1, %v22_v0  ;;  %v25_v4 = vld [vmem:[%s337_s1 + $0x18] sm:$0xff]  ;;  %v20_v6 = vld [vmem:[%s336_s0] sm:$0xff]  ;;  %v27_v8 = vld [vmem:[%s337_s1 + $0x28] sm:$0xff] }
   0x3   :  { %v197_v5 = vpack.c.bf16 %v25_v4, %v24_v2  ;;  %v26_v7 = vld [vmem:[%s337_s1 + $0x20] sm:$0xff]  ;;  %190 = vmatprep.mubr.f32.mxu0 %v20_v6 }
   0x4   :  { %194 = vmatprep.subr.bf16.mxu0 %v193_v3 }
   0x5   :  { %196 = vmatpush3.bf16.xpose.msra.mxu0 %v193_v3 }
   0x6   :  { %198 = vmatprep.subr.bf16.mxu0 %v197_v5 }
   0x7   :  { %7 = vsyncpa [#allocation4], 0  ;;  %v201_v9 = vpack.c.bf16 %v27_v8, %v26_v7  ;;  %v28_v10 = vld [vmem:[%s337_s1 + $0x30] sm:$0xff]  ;;  %v29_v11 = vld [vmem:[%s337_s1 + $0x38] sm:$0xff]  ;;  %s252_s17 = smov [#allocation3]  }
   0x8   :  { %v205_v12 = vpack.c.bf16 %v29_v11, %v28_v10  ;;  %v30_v13 = vld [vmem:[%s337_s1 + $0x40] sm:$0xff]  ;;  %v31_v14 = vld [vmem:[%s337_s1 + $0x48] sm:$0xff]  ;;  %v32_v16 = vld [vmem:[%s337_s1 + $0x50] sm:$0xff]  ;;  %s129_s18 = sshll.u32 %s252_s17, 4  ;;  %s130_s18 = int_to_ptr.vmem [resolvable:$true] %s129_s18 }
   0x9   :  { %v209_v15 = vpack.c.bf16 %v31_v14, %v30_v13  ;;  %v33_v17 = vld [vmem:[%s337_s1 + $0x58] sm:$0xff]  ;;  %v34_v19 = vld [vmem:[%s337_s1 + $0x60] sm:$0xff]  ;;  %v35_v20 = vld [vmem:[%s337_s1 + $0x68] sm:$0xff]  ;;  %s228_s19 = scalar_lea.vmem %s130_s18, 256  ;;  %p233_p1 = scmp.lt.s32.totalorder %s130_s18, %s130_s18 }
   0xa   :  { %v213_v18 = vpack.c.bf16 %v33_v17, %v32_v16  ;;  %v217_v21 = vpack.c.bf16 %v35_v20, %v34_v19  ;;  %v36_v22 = vld [vmem:[%s337_s1 + $0x70] sm:$0xff]  ;;  %v37_v23 = vld [vmem:[%s337_s1 + $0x78] sm:$0xff]  ;;  %v21_v25 = vld [vmem:[%s336_s0 + $0x8] sm:$0xff]  ;;  %p229_p0 = scmp.ne.s32.totalorder %s130_s18, %s228_s19  ;;  %p234_p2 = scmp.lt.s32.totalorder %s228_s19, %s228_s19 }
   0xb   :  { %v221_v24 = vpack.c.bf16 %v37_v23, %v36_v22 }
   0xc   :  { %p235_p3 = por %p234_p2, %p233_p1 }
   0xd   :  { %200 = vmatpush3.bf16.xpose.msra.mxu0 %v197_v5 }
   0xe   :  { %202 = vmatprep.subr.bf16.mxu0 %v201_v9  ;;  %p236_p4 = pnand %p235_p3, %p229_p0 }
  0x15   :  { %204 = vmatpush3.bf16.xpose.msra.mxu0 %v201_v9 }
  0x16   :  { %206 = vmatprep.subr.bf16.mxu0 %v205_v12 }
  0x1d   :  { %208 = vmatpush3.bf16.xpose.msra.mxu0 %v205_v12 }
  0x1e   :  { %210 = vmatprep.subr.bf16.mxu0 %v209_v15 }
  0x25   :  { %212 = vmatpush3.bf16.xpose.msra.mxu0 %v209_v15 }
  0x26   :  { %214 = vmatprep.subr.bf16.mxu0 %v213_v18 }
  0x2d   :  { %216 = vmatpush3.bf16.xpose.msra.mxu0 %v213_v18 }
  0x2e   :  { %218 = vmatprep.subr.bf16.mxu0 %v217_v21 }
  0x35   :  { %220 = vmatpush3.bf16.xpose.msra.mxu0 %v217_v21 }
  0x36   :  { %222 = vmatprep.subr.bf16.mxu0 %v221_v24 }
  0x3d   :  { %224 = vmatpush3.bf16.xpose.msra.mxu0 %v221_v24 }
  0x44   :  { %191 = vmatmul.mubr.f32.vlgmr.msra.gmra.mrb[0].mxu0 %v21_v25 }
 0x117   :  { %v192_v26 = vpop.f32.mrb[0].mxu0 }
 0x118   :  { %123 = vst [vmem:[#allocation3 + $0x8] sm:$0xff] %v192_v26  ;;  %v104_v27 = vpop.f32.mrb[1].mxu0 }
 0x119   :  { %122 = vst [vmem:[#allocation3] sm:$0xff] %v104_v27 }
 0x11a   :  { %239 = shalt.err (!%p236_p4)
}
 0x11b   :  { %s240_s21 = scalar_lea.hbm %s338_s2, 256 }
 0x11c   :  { %p241_p5 = scmp.ne.s32.totalorder %s338_s2, %s240_s21  ;;  %p244_p6 = scmp.lt.u32.totalorder %s240_s21, %s338_s2 }
 0x11e   :  { %p246_p7 = pnand %p244_p6, %p241_p5 }
 0x120   :  { %249 = shalt.err (!%p246_p7)
}
 0x121   :  { %s253_s25 = smov 128   ;;  %s254_s26 = smov 8  }
 0x122   :  { %135 = dma.vmem_to_hbm [thread:$0]  %s130_s18, 256, %s338_s2, [#allocation4], %s253_s25, %s253_s25, %s254_s26  }
 0x123   :  { %250 = dma.done.wait [#allocation4], 256  }
 0x124   :  { %251 = vsyncadd [#allocation4], 4294967040 }
 0x125   :  { %139 = vsyncpa [#allocation4], 1 }

// kernel: multi_head_attention.4
= control target key start
LH: loop header
LB: loop body
LE: loop exit
PB: predicated region body
PF: predicated region fallthrough
CT: control target
= control target key end

     0   :  { %s1987_s12 = smov 0   ;;  %s1989_s13 = smov 0   ;;  %s2262_s0 = inlined_call_operand.vmem [shape: f32[2,8,3,4,32], index: 0, kind: input, shape index: {}, may-alias: {0,1,2}]   ;;  %s2263_s1 = inlined_call_operand.vmem [shape: f32[2,8,3,4,32], index: 1, kind: input, shape index: {}, may-alias: {0,1,2}]   ;;  %s2264_s2 = inlined_call_operand.vmem [shape: f32[2,8,3,4,32], index: 2, kind: input, shape index: {}, may-alias: {0,1,2}]   ;;  %s2265_s3 = inlined_call_operand.vmem [shape: f32[2,8,4,32], index: 3, kind: output, shape index: {}]  }
   0x1   :  { %s1991_s14 = smov 0   ;;  %s1993_s15 = smov 0  }
   0x2   :  { %s1995_s16 = smov 0  }
   0x3 LB: > { %s32_s17 = sadd.s32 1, %s1955_s15  ;;  %p48_p1 = scmp.ne.s32.totalorder %s1947_s13, %s1943_s12  ;;  %s1959_s16 = sphi %s1995_s16, %s13_s16   ;;  %s1955_s15 = sphi %s1993_s15, %s2270_s15   ;;  %s1951_s14 = sphi %s1991_s14, %s2269_s14   ;;  %s1947_s13 = sphi %s1989_s13, %s2268_s13   ;;  %s1943_s12 = sphi %s1987_s12, %s2267_s12  }
   0x4   : > { %p34_p0 = scmp.ge.s32.totalorder %s32_s17, 2  ;;  %p49_p2 = scmp.eq.s32.totalorder %s1959_s16, 0 }
   0x5   : > { %s41_s20 = sadd.s32 1, %s1947_s13  ;;  %p1740_p5 = scmp.ge.s32.totalorder %s1959_s16, 2 }
   0x6   : > { %s2272_s17 = smov (%p34_p0, %s32_s17), 0  ;;  %p2018_p3 = por %p49_p2, %p48_p1 }
   0x7   : > { %s36_s19 = ssub.s32 %s1955_s15, %s2272_s17  ;;  %158 = sbr.rel (%p1740_p5) target bundleno = 44 (0x2c), region = 16 }
   0x8   : > { %p39_p4 = scmp.eq.s32.totalorder %s36_s19, 0 }
   0xa   : > { %s2026_s21 = scalar_select %p39_p4, %s1947_s13, %s41_s20  }
   0xe   : > { %161 = sbr.rel (!%p2018_p3) target bundleno = 24 (0x18), region = 20  ;;  %s163_s22 = sand.u32 (%p2018_p3), 1, %s1947_s13  }
   0xf   : > { %s1840_s23 = smul.u32 (%p2018_p3), 96, %s1955_s15  ;;  %s1741_s24 = sshll.u32 (%p2018_p3), %s163_s22, 5 }
  0x10   : > { %s165_s28 = scalar_lea.vmem (%p2018_p3), [#allocation5], %s1741_s24 }
  0x11   : > { %s171_s27 = scalar_lea.vmem (%p2018_p3), %s2262_s0, %s1840_s23 }
  0x12   : > { %v187_v0 = vld [vmem:[%s171_s27] sm:$0xf] (%p2018_p3)  ;;  %v189_v1 = vld [vmem:[%s171_s27 + $0xc] sm:$0xf] (%p2018_p3)  ;;  %v191_v2 = vld [vmem:[%s171_s27 + $0x18] sm:$0xf] (%p2018_p3) }
  0x13   : > { %188 = vst [vmem:[%s165_s28] sm:$0xf] (%p2018_p3), %v187_v0  ;;  %190 = vst [vmem:[%s165_s28 + $0x4] sm:$0xf] (%p2018_p3), %v189_v1  ;;  %v193_v3 = vld [vmem:[%s171_s27 + $0x24] sm:$0xf] (%p2018_p3) }
  0x14   : > { %192 = vst [vmem:[%s165_s28 + $0x8] sm:$0xf] (%p2018_p3), %v191_v2  ;;  %v195_v4 = vld [vmem:[%s171_s27 + $0x30] sm:$0xf] (%p2018_p3)  ;;  %v197_v5 = vld [vmem:[%s171_s27 + $0x3c] sm:$0xf] (%p2018_p3) }
  0x15   : > { %194 = vst [vmem:[%s165_s28 + $0xc] sm:$0xf] %v193_v3  ;;  %196 = vst [vmem:[%s165_s28 + $0x10] sm:$0xf] %v195_v4  ;;  %v199_v6 = vld [vmem:[%s171_s27 + $0x48] sm:$0xf] }
  0x16   : > { %198 = vst [vmem:[%s165_s28 + $0x14] sm:$0xf] %v197_v5  ;;  %v201_v7 = vld [vmem:[%s171_s27 + $0x54] sm:$0xf]  ;;  %200 = vst [vmem:[%s165_s28 + $0x18] sm:$0xf] %v199_v6 }
  0x17   : > { %202 = vst [vmem:[%s165_s28 + $0x1c] sm:$0xf] %v201_v7 }
  0x18 PF: > { %241 = sbr.rel (!%p2018_p3) target bundleno = 34 (0x22), region = 61  ;;  %s243_s29 = sand.u32 (%p2018_p3), 1, %s1947_s13  }
  0x19   : > { %s1744_s30 = smul.u32 (%p2018_p3), 96, %s1955_s15  ;;  %s1743_s4 = sshll.u32 (%p2018_p3), %s243_s29, 5 }
  0x1a   : > { %s245_s8 = scalar_lea.vmem (%p2018_p3), [#allocation6], %s1743_s4 }
  0x1b   : > { %s1643_s7 = scalar_lea.vmem (%p2018_p3), %s2263_s1, %s1744_s30 }
  0x1c   : > { %v1745_v8 = vld [vmem:[%s1643_s7 + $0x4] sm:$0xf] (%p2018_p3)  ;;  %v1746_v9 = vld [vmem:[%s1643_s7 + $0x10] sm:$0xf] (%p2018_p3)  ;;  %v1747_v10 = vld [vmem:[%s1643_s7 + $0x1c] sm:$0xf] (%p2018_p3) }
  0x1d   : > { %269 = vst [vmem:[%s245_s8] sm:$0xf] (%p2018_p3), %v1745_v8  ;;  %271 = vst [vmem:[%s245_s8 + $0x4] sm:$0xf] (%p2018_p3), %v1746_v9  ;;  %v1748_v11 = vld [vmem:[%s1643_s7 + $0x28] sm:$0xf] (%p2018_p3) }
  0x1e   : > { %273 = vst [vmem:[%s245_s8 + $0x8] sm:$0xf] (%p2018_p3), %v1747_v10  ;;  %v1749_v12 = vld [vmem:[%s1643_s7 + $0x34] sm:$0xf] (%p2018_p3)  ;;  %v1750_v13 = vld [vmem:[%s1643_s7 + $0x40] sm:$0xf] (%p2018_p3) }
  0x1f   : > { %275 = vst [vmem:[%s245_s8 + $0xc] sm:$0xf] %v1748_v11  ;;  %277 = vst [vmem:[%s245_s8 + $0x10] sm:$0xf] %v1749_v12  ;;  %v1751_v14 = vld [vmem:[%s1643_s7 + $0x4c] sm:$0xf] }
  0x20   : > { %279 = vst [vmem:[%s245_s8 + $0x14] sm:$0xf] %v1750_v13  ;;  %v1752_v15 = vld [vmem:[%s1643_s7 + $0x58] sm:$0xf]  ;;  %281 = vst [vmem:[%s245_s8 + $0x18] sm:$0xf] %v1751_v14 }
  0x21   : > { %283 = vst [vmem:[%s245_s8 + $0x1c] sm:$0xf] %v1752_v15 }
  0x22 PF: > { %322 = sbr.rel (!%p2018_p3) target bundleno = 44 (0x2c), region = 102  ;;  %s324_s9 = sand.u32 (%p2018_p3), 1, %s1947_s13  }
  0x23   : > { %s1754_s10 = smul.u32 (%p2018_p3), 96, %s1955_s15  ;;  %s1753_s11 = sshll.u32 (%p2018_p3), %s324_s9, 5 }
  0x24   : > { %s326_s23 = scalar_lea.vmem (%p2018_p3), [#allocation7], %s1753_s11 }
  0x25   : > { %s1651_s22 = scalar_lea.vmem (%p2018_p3), %s2264_s2, %s1754_s10 }
  0x26   : > { %v1755_v16 = vld [vmem:[%s1651_s22 + $0x8] sm:$0xf] (%p2018_p3)  ;;  %v1756_v17 = vld [vmem:[%s1651_s22 + $0x14] sm:$0xf] (%p2018_p3)  ;;  %v1757_v18 = vld [vmem:[%s1651_s22 + $0x20] sm:$0xf] (%p2018_p3) }
  0x27   : > { %350 = vst [vmem:[%s326_s23] sm:$0xf] (%p2018_p3), %v1755_v16  ;;  %352 = vst [vmem:[%s326_s23 + $0x4] sm:$0xf] (%p2018_p3), %v1756_v17  ;;  %v1758_v19 = vld [vmem:[%s1651_s22 + $0x2c] sm:$0xf] (%p2018_p3) }
  0x28   : > { %354 = vst [vmem:[%s326_s23 + $0x8] sm:$0xf] (%p2018_p3), %v1757_v18  ;;  %v1759_v20 = vld [vmem:[%s1651_s22 + $0x38] sm:$0xf] (%p2018_p3)  ;;  %v1760_v21 = vld [vmem:[%s1651_s22 + $0x44] sm:$0xf] (%p2018_p3) }
  0x29   : > { %356 = vst [vmem:[%s326_s23 + $0xc] sm:$0xf] %v1758_v19  ;;  %358 = vst [vmem:[%s326_s23 + $0x10] sm:$0xf] %v1759_v20  ;;  %v1761_v22 = vld [vmem:[%s1651_s22 + $0x50] sm:$0xf] }
  0x2a   : > { %360 = vst [vmem:[%s326_s23 + $0x14] sm:$0xf] %v1760_v21  ;;  %v1762_v23 = vld [vmem:[%s1651_s22 + $0x5c] sm:$0xf]  ;;  %362 = vst [vmem:[%s326_s23 + $0x18] sm:$0xf] %v1761_v22 }
  0x2b   : > { %364 = vst [vmem:[%s326_s23 + $0x1c] sm:$0xf] %v1762_v23 }
  0x2c PF: > { %p1763_p6 = scmp.ge.s32.totalorder %s1959_s16, 1  ;;  %p402_p7 = scmp.lt.s32.totalorder %s1959_s16, 3 }
  0x2e   : > { %p403_p8 = pnand %p1763_p6, %p402_p7 }
  0x2f   : > { %s409_s18 = sand.u32 (!%p403_p8), 1, %s1943_s12   ;;  %vm484_vm0 = vcmask (!%p403_p8), 261120   ;;  %v509_v24 = vlaneseq (!%p403_p8)  ;;  %v1961_v25 = vmov (!%p403_p8), 0.0   ;;  %v1962_v26 = vmov (!%p403_p8), 1983009808   ;;  %p462_p9 = scmp.lt.s32.totalorder (!%p403_p8), %s1951_s14, 1 }
  0x30   : > { %406 = sbr.rel (%p403_p8) target bundleno = 898 (0x382), region = 143  ;;  %1800 = vmatprep.subr.mxu0 (!%p403_p8), %v1961_v25  ;;  %s2054_s24 = sshll.u32 (!%p403_p8), %s409_s18, 5  ;;  %v507_v27 = vunpack.c.l.s4 (!%p403_p8), %v1962_v26  ;;  %485 = vst.msk [vmem:[#allocation4] sm:$0xff] (!%p403_p8), %vm484_vm0, %v1961_v25  ;;  %486 = vst.msk [vmem:[#allocation4 + $0x8] sm:$0xff] (!%p403_p8), %vm484_vm0, %v1961_v25  ;;  %1805 = vmatprep.subr.mxu1 (!%p403_p8), %v1961_v25  ;;  %v1963_v29 = vmov (!%p403_p8), 1934713408  }
  0x31   : > { %487 = vst.msk [vmem:[#allocation4 + $0x10] sm:$0xff] (!%p403_p8), %vm484_vm0, %v1961_v25  ;;  %488 = vst.msk [vmem:[#allocation4 + $0x18] sm:$0xff] (!%p403_p8), %vm484_vm0, %v1961_v25  ;;  %v510_v28 = vshrl.u32 (!%p403_p8), %v509_v24, 7  ;;  %v540_v30 = vunpack.c.l.s4 (!%p403_p8), %v1963_v29  ;;  %vm1964_vm1 = vmmov (!%p403_p8), 0   ;;  %s418_s12 = scalar_lea.vmem (!%p403_p8), [#allocation6], %s2054_s24  ;;  %s411_s25 = scalar_lea.vmem (!%p403_p8), [#allocation5], %s2054_s24 }
  0x32   : > { %1802 = vmatprep.mubr.msk.f32.mxu0 (!%p403_p8), %vm1964_vm1, %v1961_v25  ;;  %1807 = vmatprep.mubr.msk.f32.mxu1 (!%p403_p8), %vm1964_vm1, %v1961_v25  ;;  %v508_v31 = vunpack.c.0.s8 (!%p403_p8), %v507_v27  ;;  %v1889_v34 = vld [vmem:[%s418_s12] ss:$8 sps:$4 sm:$0xff] (!%p403_p8)   ;;  %v1890_v35 = vld [vmem:[%s418_s12 + $0x4] ss:$8 sps:$4 sm:$0xff] (!%p403_p8)   ;;  %v1891_v36 = vld [vmem:[%s418_s12 + $0x10] ss:$8 sps:$4 sm:$0xff] (!%p403_p8)  }
  0x33   : > { %v541_v32 = vunpack.c.0.s8 (!%p403_p8), %v540_v30  ;;  %v1892_v37 = vld [vmem:[%s418_s12 + $0x14] ss:$8 sps:$4 sm:$0xff] (!%p403_p8)   ;;  %v489_v39 = vld [vmem:[%s411_s25] sm:$0xf] (!%p403_p8)  ;;  %v490_v44 = vld [vmem:[%s411_s25 + $0x4] sm:$0xf] (!%p403_p8) }
  0x34   : > { %v2070_v33 = vsub.s32 (!%p403_p8), %v508_v31, %v510_v28  ;;  %v491_v45 = vld [vmem:[%s411_s25 + $0x8] sm:$0xf] (!%p403_p8)  ;;  %v492_v46 = vld [vmem:[%s411_s25 + $0xc] sm:$0xf] (!%p403_p8)  ;;  %v493_v47 = vld [vmem:[%s411_s25 + $0x10] sm:$0xf] (!%p403_p8) }
  0x35   : > { %v2074_v40 = vsub.s32 (!%p403_p8), %v541_v32, %v510_v28  ;;  %v494_v48 = vld [vmem:[%s411_s25 + $0x14] sm:$0xf] (!%p403_p8)  ;;  %v497_v49 = vmul.f32 (!%p403_p8), 0.17677669, %v489_v39  ;;  %v495_v52 = vld [vmem:[%s411_s25 + $0x18] sm:$0xf] (!%p403_p8) }
  0x36   : > { %v588_v38 = vrot.slane (!%p403_p8), %v1889_v34, %v2070_v33  ;;  %v596_v41 = vrot.slane (!%p403_p8), %v1890_v35, %v2070_v33  ;;  %v604_v42 = vrot.slane (!%p403_p8), %v1891_v36, %v2070_v33  ;;  %v612_v43 = vrot.slane (!%p403_p8), %v1892_v37, %v2070_v33  ;;  %v496_v53 = vld [vmem:[%s411_s25 + $0x1c] sm:$0xf] (!%p403_p8)  ;;  %s425_s26 = scalar_lea.vmem (!%p403_p8), [#allocation7], %s2054_s24 }
  0x37   : > { %v498_v54 = vmul.f32 0.17677669, %v490_v44  ;;  %v499_v55 = vmul.f32 0.17677669, %v491_v45  ;;  %v500_v56 = vmul.f32 0.17677669, %v492_v46 }
  0x38   : > { %v613_v50 = vcombine.low %v588_v38, %v596_v41  ;;  %v629_v51 = vcombine.low %v604_v42, %v612_v43  ;;  %v501_v59 = vmul.f32 0.17677669, %v493_v47  ;;  %v502_v60 = vmul.f32 0.17677669, %v494_v48  ;;  %s2274_s14 = smov (!%p462_p9, %s1951_s14), 1 }
  0x39   : > { %v503_v61 = vmul.f32 0.17677669, %v495_v52  ;;  %v504_v62 = vmul.f32 0.17677669, %v496_v53  ;;  %v505_v63 = vcombine.low %v497_v49, %v499_v55  ;;  %v513_v0 = vcombine.low %v498_v54, %v500_v56  ;;  %s1783_s27 = sshll.u32 %s2274_s14, 5 }
  0x3a   : > { %v621_v57 = vrot.slane %v613_v50, %v2074_v40  ;;  %v637_v58 = vrot.slane %v629_v51, %v2074_v40  ;;  %v614_v1 = vcombine.high %v588_v38, %v596_v41  ;;  %v630_v2 = vcombine.high %v604_v42, %v612_v43  ;;  %s469_s30 = scalar_lea.vmem %s2265_s3, %s1783_s27 }
  0x3b   : > { %v512_v5 = vrot.slane %v505_v63, %v2070_v33  ;;  %v520_v6 = vrot.slane %v513_v0, %v2070_v33  ;;  %v521_v7 = vcombine.low %v501_v59, %v503_v61  ;;  %v529_v8 = vcombine.low %v502_v60, %v504_v62  ;;  %v1893_v0 = vld [vmem:[%s425_s26] ss:$8 sps:$4 sm:$0xff]  }
  0x3c   : > { %v645_v3 = vcombine.low %v621_v57, %v637_v58  ;;  %v646_v4 = vcombine.high %v621_v57, %v637_v58  ;;  %v628_v13 = vrot.slane %v614_v1, %v2074_v40  ;;  %v644_v14 = vrot.slane %v630_v2, %v2074_v40  ;;  %v1894_v1 = vld [vmem:[%s425_s26 + $0x4] ss:$8 sps:$4 sm:$0xff]   ;;  %v1895_v2 = vld [vmem:[%s425_s26 + $0x10] ss:$8 sps:$4 sm:$0xff]  }
  0x3d   : > { %v528_v9 = vrot.slane %v521_v7, %v2070_v33  ;;  %v536_v10 = vrot.slane %v529_v8, %v2070_v33  ;;  %v537_v11 = vcombine.low %v512_v5, %v520_v6  ;;  %v538_v12 = vcombine.high %v512_v5, %v520_v6 }
  0x3e   : > { %1801 = vmatpush3.xpose.msk.msra.mxu0 %vm484_vm0, %v645_v3  ;;  %1806 = vmatpush3.xpose.msk.msra.mxu1 %vm484_vm0, %v646_v4  ;;  %v647_v21 = vcombine.low %v628_v13, %v644_v14  ;;  %v648_v24 = vcombine.high %v628_v13, %v644_v14  ;;  %vm475_vm2 = vcmask 7168   ;;  %v1965_v28 = vmov -inf   ;;  %v1896_v3 = vld [vmem:[%s425_s26 + $0x14] ss:$8 sps:$4 sm:$0xff]  }
  0x3f   : > { %1810 = vmatprep.subr.mxu0 %v1961_v25  ;;  %1815 = vmatprep.subr.mxu1 %v1961_v25  ;;  %v545_v15 = vrot.slane %v537_v11, %v2074_v40  ;;  %v553_v16 = vcombine.low %v528_v9, %v536_v10  ;;  %v554_v17 = vcombine.high %v528_v9, %v536_v10  ;;  %vm1034_vm3 = vcmask 64512  }
  0x40   : > { %v552_v19 = vrot.slane %v538_v12, %v2074_v40  ;;  %476 = vst.msk [vmem:[#allocation2] sm:$0xff] %vm475_vm2, %v1965_v28  ;;  %477 = vst.msk [vmem:[#allocation2 + $0x8] sm:$0xff] %vm475_vm2, %v1965_v28  ;;  %v1966_v43 = vmov 0   ;;  %v664_v4 = vrot.slane %v1893_v0, %v2070_v33  ;;  %v672_v5 = vrot.slane %v1894_v1, %v2070_v33 }
  0x41   : > { %v561_v18 = vrot.slane %v553_v16, %v2074_v40  ;;  %v568_v20 = vrot.slane %v554_v17, %v2074_v40  ;;  %478 = vst.msk [vmem:[#allocation2 + $0x10] sm:$0xff] %vm475_vm2, %v1965_v28  ;;  %479 = vst.msk [vmem:[#allocation2 + $0x18] sm:$0xff] %vm475_vm2, %v1965_v28  ;;  %1887 = vset.pattern.permute.xlu0 %v1966_v43  ;;  %1888 = vset.pattern.permute.xlu1 %v1966_v43  ;;  %vm1591_vm12 = vcmask 257024  }
  0x42   : > { %480 = vst.msk [vmem:[#allocation3] sm:$0xff] %vm475_vm2, %v1961_v25  ;;  %481 = vst.msk [vmem:[#allocation3 + $0x8] sm:$0xff] %vm475_vm2, %v1961_v25  ;;  %v680_v6 = vrot.slane %v1895_v2, %v2070_v33  ;;  %v688_v7 = vrot.slane %v1896_v3, %v2070_v33  ;;  %v689_v8 = vcombine.low %v664_v4, %v672_v5 }
  0x43   : > { %v569_v22 = vcombine.low %v545_v15, %v561_v18  ;;  %v570_v23 = vcombine.high %v545_v15, %v561_v18  ;;  %v571_v26 = vcombine.low %v552_v19, %v568_v20  ;;  %v572_v27 = vcombine.high %v552_v19, %v568_v20  ;;  %482 = vst.msk [vmem:[#allocation3 + $0x10] sm:$0xff] %vm475_vm2, %v1961_v25 }
  0x44   : > { %483 = vst.msk [vmem:[#allocation3 + $0x18] sm:$0xff] %vm475_vm2, %v1961_v25  ;;  %v705_v9 = vcombine.low %v680_v6, %v688_v7  ;;  %v697_v10 = vrot.slane %v689_v8, %v2074_v40  ;;  %v690_v12 = vcombine.high %v664_v4, %v672_v5  ;;  %v706_v13 = vcombine.high %v680_v6, %v688_v7 }
  0x45   : > { %1803 = vmatmul.mubr.msk.f32.vlgmr.msra.gmra.mrb[0].mxu0 %vm484_vm0, %v569_v22  ;;  %1808 = vmatmul.mubr.msk.f32.vlgmr.msra.gmra.mrb[0].mxu1 %vm484_vm0, %v570_v23 }
  0x46   : > { %1811 = vmatpush3.xpose.msk.msra.mxu0 %vm484_vm0, %v647_v21  ;;  %1812 = vmatprep.mubr.msk.f32.mxu0 %vm1964_vm1, %v1961_v25  ;;  %v713_v11 = vrot.slane %v705_v9, %v2074_v40  ;;  %v704_v16 = vrot.slane %v690_v12, %v2074_v40  ;;  %v720_v17 = vrot.slane %v706_v13, %v2074_v40 }
  0x47   : > { %1816 = vmatpush3.xpose.msk.msra.mxu1 %vm484_vm0, %v648_v24  ;;  %1817 = vmatprep.mubr.msk.f32.mxu1 %vm1964_vm1, %v1961_v25  ;;  %v2139_v44 = vld [vmem:[#allocation2] sm:$0xff]  ;;  %v2142_v47 = vld [vmem:[#allocation2 + $0x8] sm:$0xff] }
  0x48   : > { %1820 = vmatprep.subr.mxu0 %v1961_v25  ;;  %1825 = vmatprep.subr.mxu1 %v1961_v25  ;;  %v2144_v48 = vld [vmem:[#allocation2 + $0x10] sm:$0xff]  ;;  %v2154_v55 = vld [vmem:[#allocation2 + $0x18] sm:$0xff]  ;;  %v721_v14 = vcombine.low %v697_v10, %v713_v11  ;;  %v722_v15 = vcombine.high %v697_v10, %v713_v11  ;;  %v723_v18 = vcombine.low %v704_v16, %v720_v17 }
  0x49   : > { %1813 = vmatmul.mubr.msk.f32.vlgmr.msra.gmra.mrb[2].mxu0 %vm484_vm0, %v571_v26  ;;  %v724_v19 = vcombine.high %v704_v16, %v720_v17 }
  0x4a   : > { %1818 = vmatmul.mubr.msk.f32.vlgmr.msra.gmra.mrb[2].mxu1 %vm484_vm0, %v572_v27  ;;  %1822 = vmatprep.mubr.msk.f32.mxu0 %vm1964_vm1, %v1961_v25 }
  0x4b   : > { %1827 = vmatprep.mubr.msk.f32.mxu1 %vm1964_vm1, %v1961_v25  ;;  %1821 = vmatpush3.msra.mxu0 %v721_v14 }
  0x4c   : > { %1826 = vmatpush3.msra.mxu1 %v722_v15  ;;  %1830 = vmatprep.subr.mxu0 %v1961_v25 }
  0x4d   : > { %1835 = vmatprep.subr.mxu1 %v1961_v25 }
 0x118   : > { %v2123_v29 = vpop.f32.mrb[0].mxu0  ;;  %v2125_v30 = vpop.f32.mrb[0].mxu1 }
 0x119   : > { %v1804_v31 = vpop.f32.mrb[1].mxu0  ;;  %v1035_v32 = vsel %vm1034_vm3, %v2123_v29, -inf  ;;  %v1809_v34 = vpop.f32.mrb[1].mxu1  ;;  %v1038_v35 = vsel %vm1034_vm3, %v2125_v30, -inf }
 0x11a   : > { %1036 = vmax.xlane.f32.xlu0 %v1035_v32 }
 0x11c   : > { %v2131_v36 = vpop.f32.mrb[2].mxu0 }
 0x11d   : > { %v1814_v37 = vpop.f32.mrb[3].mxu0  ;;  %v1041_v38 = vsel %vm1034_vm3, %v2131_v36, -inf  ;;  %v2135_v39 = vpop.f32.mrb[2].mxu1 }
 0x11e   : > { %1039 = vmax.xlane.f32.xlu0 %v1038_v35  ;;  %1042 = vmax.xlane.f32.xlu1 %v1041_v38  ;;  %v1819_v41 = vpop.f32.mrb[3].mxu1  ;;  %v1044_v42 = vsel %vm1034_vm3, %v2135_v39, -inf }
 0x122   : > { %1045 = vmax.xlane.f32.xlu1 %v1044_v42 }
 0x1a7   : > { %v1037_v45 = vpop.xlane.xlu0 %1036 }
 0x1a8   : > { %v1047_v46 = vmax.f32 %v2139_v44, %v1037_v45 }
 0x1aa   : > { %1460 = vst.msk [vmem:[#allocation2] sm:$0xff] %vm475_vm2, %v1047_v46  ;;  %vm1051_vm4 = vcmp.eq.f32.partialorder %v1047_v46, -inf }
 0x1ab   : > { %v1040_v49 = vpop.xlane.xlu0 %1039  ;;  %v2147_v50 = vsel %vm1051_vm4, 0.0, %v1047_v46  ;;  %v1043_v51 = vpop.xlane.xlu1 %1042 }
 0x1ac   : > { %v1048_v52 = vmax.f32 %v2142_v47, %v1040_v49  ;;  %1073 = vperm.xlu0 %1887, %v2147_v50   ;;  %v1059_v53 = vsub.f32 %v2139_v44, %v2147_v50  ;;  %v1049_v54 = vmax.f32 %v2144_v48, %v1043_v51  ;;  %v1103_v50 = vld [vmem:[#allocation3] sm:$0xff] }
 0x1ae   : > { %1461 = vst.msk [vmem:[#allocation2 + $0x8] sm:$0xff] %vm475_vm2, %v1048_v52  ;;  %1462 = vst.msk [vmem:[#allocation2 + $0x10] sm:$0xff] %vm475_vm2, %v1049_v54  ;;  %vm1052_vm5 = vcmp.eq.f32.partialorder %v1048_v52, -inf  ;;  %vm1053_vm6 = vcmp.eq.f32.partialorder %v1049_v54, -inf  ;;  %v1063_v45 = vmul.f32 1.442695, %v1059_v53 }
 0x1af   : > { %v2158_v56 = vsel %vm1052_vm5, 0.0, %v1048_v52  ;;  %v1046_v57 = vpop.xlane.xlu1 %1045  ;;  %v2160_v58 = vsel %vm1053_vm6, 0.0, %v1049_v54 }
 0x1b0   : > { %v1060_v59 = vsub.f32 %v2142_v47, %v2158_v56  ;;  %1078 = vperm.xlu1 %1888, %v2158_v56   ;;  %v1050_v60 = vmax.f32 %v2154_v55, %v1046_v57  ;;  %v1061_v61 = vsub.f32 %v2144_v48, %v2160_v58  ;;  %v1104_v56 = vld [vmem:[#allocation3 + $0x8] sm:$0xff] }
 0x1b2   : > { %1463 = vst.msk [vmem:[#allocation2 + $0x18] sm:$0xff] %vm475_vm2, %v1050_v60  ;;  %vm1054_vm7 = vcmp.eq.f32.partialorder %v1050_v60, -inf  ;;  %v1065_v42 = vmul.f32 1.442695, %v1060_v59  ;;  %v1067_v46 = vmul.f32 1.442695, %v1061_v61 }
 0x1b3   : > { %v2170_v62 = vsel %vm1054_vm7, 0.0, %v1050_v60 }
 0x1b4   : > { %1083 = vperm.xlu1 %1888, %v2160_v58   ;;  %v1062_v63 = vsub.f32 %v2154_v55, %v2170_v62  ;;  %v1105_v55 = vld [vmem:[#allocation3 + $0x10] sm:$0xff] }
 0x1b6   : > { %v1069_v47 = vmul.f32 1.442695, %v1062_v63 }
 0x1b8   : > { %1088 = vperm.xlu1 %1888, %v2170_v62   ;;  %v1106_v62 = vld [vmem:[#allocation3 + $0x18] sm:$0xff] }
 0x22b   : > { %v1074_v20 = vpop.permute.xlu0 %1073 }
 0x22c   : > { %v1091_v21 = vsub.f32 %v2123_v29, %v1074_v20 }
 0x22e   : > { %v1095_v22 = vmul.f32 1.442695, %v1091_v21 }
 0x22f   : > { %v1079_v23 = vpop.permute.xlu1 %1078 }
 0x230   : > { %1897 = vpow2.f32 %v1095_v22  ;;  %v1092_v24 = vsub.f32 %v2125_v30, %v1079_v23 }
 0x232   : > { %v1097_v26 = vmul.f32 1.442695, %v1092_v24 }
 0x233   : > { %v1084_v27 = vpop.permute.xlu1 %1083 }
 0x234   : > { %1899 = vpow2.f32 %v1097_v26  ;;  %v1093_v28 = vsub.f32 %v2131_v36, %v1084_v27 }
 0x236   : > { %v1099_v31 = vmul.f32 1.442695, %v1093_v28  ;;  %v1132_v28 = vld [vmem:[#allocation4] sm:$0xff] }
 0x237   : > { %v1089_v32 = vpop.permute.xlu1 %1088 }
 0x238   : > { %1901 = vpow2.f32 %v1099_v31  ;;  %v1094_v34 = vsub.f32 %v2135_v39, %v1089_v32 }
 0x23a   : > { %v1898_v35 = vpop.eup %1897  ;;  %v1101_v37 = vmul.f32 1.442695, %v1094_v34  ;;  %v1133_v34 = vld [vmem:[#allocation4 + $0x8] sm:$0xff] }
 0x23b   : > { %1823 = vmatmul.mubr.msk.f32.vlgmr.msra.gmra.mrb[4].mxu0 %vm1034_vm3, %v1898_v35  ;;  %v1111_v29 = vsel %vm1034_vm3, %v1898_v35, 0.0 }
 0x23c   : > { %1903 = vpow2.f32 %v1101_v37  ;;  %1112 = vadd.xlane.f32.xlu1 %v1111_v29  ;;  %1831 = vmatpush3.msra.mxu0 %v723_v18 }
 0x23d   : > { %1832 = vmatprep.mubr.msk.f32.mxu0 %vm1964_vm1, %v1961_v25  ;;  %1905 = vpow2.f32 %v1065_v42 }
 0x23e   : > { %v1900_v30 = vpop.eup %1899  ;;  %1907 = vpow2.f32 %v1063_v45 }
 0x23f   : > { %1828 = vmatmul.mubr.msk.f32.vlgmr.msra.gmra.mrb[4].mxu1 %vm1034_vm3, %v1900_v30  ;;  %v1114_v36 = vsel %vm1034_vm3, %v1900_v30, 0.0  ;;  %1909 = vpow2.f32 %v1067_v46  ;;  %v1135_v46 = vld [vmem:[#allocation4 + $0x18] sm:$0xff] }
 0x240   : > { %1115 = vadd.xlane.f32.xlu0 %v1114_v36  ;;  %1836 = vmatpush3.msra.mxu1 %v724_v19  ;;  %1911 = vpow2.f32 %v1069_v47 }
 0x241   : > { %1837 = vmatprep.mubr.msk.f32.mxu1 %vm1964_vm1, %v1961_v25 }
 0x242   : > { %v1902_v38 = vpop.eup %1901 }
 0x243   : > { %1833 = vmatmul.mubr.msk.f32.vlgmr.msra.gmra.mrb[6].mxu0 %vm1034_vm3, %v1902_v38  ;;  %v1117_v39 = vsel %vm1034_vm3, %v1902_v38, 0.0 }
 0x244   : > { %1118 = vadd.xlane.f32.xlu1 %v1117_v39  ;;  %v1134_v39 = vld [vmem:[#allocation4 + $0x10] sm:$0xff] }
 0x246   : > { %v1904_v41 = vpop.eup %1903 }
 0x247   : > { %1838 = vmatmul.mubr.msk.f32.vlgmr.msra.gmra.mrb[6].mxu1 %vm1034_vm3, %v1904_v41  ;;  %v1120_v43 = vsel %vm1034_vm3, %v1904_v41, 0.0  ;;  %v1906_v49 = vpop.eup %1905 }
 0x248   : > { %1121 = vadd.xlane.f32.xlu1 %v1120_v43  ;;  %v1908_v51 = vpop.eup %1907  ;;  %v1108_v57 = vmul.f32 %v1906_v49, %v1104_v56 }
 0x249   : > { %v1910_v52 = vpop.eup %1909  ;;  %v1107_v53 = vmul.f32 %v1908_v51, %v1103_v50 }
 0x24a   : > { %v1912_v44 = vpop.eup %1911  ;;  %v1109_v60 = vmul.f32 %v1910_v52, %v1105_v55 }
 0x24b   : > { %v1110_v1 = vmul.f32 %v1912_v44, %v1106_v62 }
 0x256   : > { %1143 = vperm.xlu0 %1887, %v1906_v49  }
 0x259   : > { %1138 = vperm.xlu1 %1888, %v1908_v51  }
 0x25d   : > { %1148 = vperm.xlu1 %1888, %v1910_v52  }
 0x261   : > { %1153 = vperm.xlu1 %1888, %v1912_v44  }
 0x2c9   : > { %v1113_v54 = vpop.xlane.xlu1 %1112 }
 0x2ca   : > { %v1123_v48 = vadd.f32 %v1113_v54, %v1107_v53 }
 0x2cc   : > { %1128 = vst.msk [vmem:[#allocation3] sm:$0xff] %vm475_vm2, %v1123_v48 }
 0x2cd   : > { %v1116_v58 = vpop.xlane.xlu0 %1115 }
 0x2ce   : > { %v1124_v59 = vadd.f32 %v1116_v58, %v1108_v57 }
 0x2d0   : > { %1129 = vst.msk [vmem:[#allocation3 + $0x8] sm:$0xff] %vm475_vm2, %v1124_v59 }
 0x2d1   : > { %v1119_v61 = vpop.xlane.xlu1 %1118 }
 0x2d2   : > { %v1125_v63 = vadd.f32 %v1119_v61, %v1109_v60 }
 0x2d3   : > { %v1467_v0 = vld [vmem:[#allocation3] sm:$0xff] }
 0x2d4   : > { %1130 = vst.msk [vmem:[#allocation3 + $0x10] sm:$0xff] %vm475_vm2, %v1125_v63  ;;  %vm1471_vm8 = vcmp.eq.f32.partialorder %v1467_v0, 0.0 }
 0x2d5   : > { %v1122_v2 = vpop.xlane.xlu1 %1121  ;;  %v1475_v3 = vsel %vm1471_vm8, 1.0, %v1467_v0  ;;  %v1144_v35 = vpop.permute.xlu0 %1143 }
 0x2d6   : > { %v1126_v4 = vadd.f32 %v1122_v2, %v1110_v1  ;;  %1913 = vrcp.f32 %v1475_v3  ;;  %v1157_v38 = vmul.f32 %v1144_v35, %v1133_v34 }
 0x2d7   : > { %v1468_v5 = vld [vmem:[#allocation3 + $0x8] sm:$0xff] }
 0x2d8   : > { %1131 = vst.msk [vmem:[#allocation3 + $0x18] sm:$0xff] %vm475_vm2, %v1126_v4  ;;  %vm1472_vm9 = vcmp.eq.f32.partialorder %v1468_v5, 0.0 }
 0x2d9   : > { %v1476_v6 = vsel %vm1472_vm9, 1.0, %v1468_v5  ;;  %v1139_v31 = vpop.permute.xlu1 %1138 }
 0x2da   : > { %1915 = vrcp.f32 %v1476_v6  ;;  %v1156_v32 = vmul.f32 %v1139_v31, %v1132_v28 }
 0x2db   : > { %v1469_v7 = vld [vmem:[#allocation3 + $0x10] sm:$0xff] }
 0x2dc   : > { %vm1473_vm10 = vcmp.eq.f32.partialorder %v1469_v7, 0.0 }
 0x2dd   : > { %v1477_v8 = vsel %vm1473_vm10, 1.0, %v1469_v7  ;;  %v1149_v36 = vpop.permute.xlu1 %1148 }
 0x2de   : > { %1917 = vrcp.f32 %v1477_v8  ;;  %v1158_v45 = vmul.f32 %v1149_v36, %v1134_v39 }
 0x2df   : > { %v1470_v9 = vld [vmem:[#allocation3 + $0x18] sm:$0xff] }
 0x2e0   : > { %v1914_v10 = vpop.eup %1913  ;;  %vm1474_vm11 = vcmp.eq.f32.partialorder %v1470_v9, 0.0 }
 0x2e1   : > { %v1483_v11 = vmul.f32 %v1914_v10, %v1475_v3  ;;  %v1478_v12 = vsel %vm1474_vm11, 1.0, %v1470_v9  ;;  %v1154_v47 = vpop.permute.xlu1 %1153 }
 0x2e2   : > { %1919 = vrcp.f32 %v1478_v12  ;;  %v1159_v44 = vmul.f32 %v1154_v47, %v1135_v46 }
 0x2e3   : > { %v1487_v13 = vsub.f32 2.0, %v1483_v11 }
 0x2e4   : > { %v1916_v14 = vpop.eup %1915 }
 0x2e5   : > { %v1491_v15 = vmul.f32 %v1914_v10, %v1487_v13  ;;  %v1484_v16 = vmul.f32 %v1916_v14, %v1476_v6 }
 0x2e7   : > { %1501 = vperm.xlu1 %1888, %v1491_v15   ;;  %v1488_v17 = vsub.f32 2.0, %v1484_v16 }
 0x2e8   : > { %v1918_v18 = vpop.eup %1917 }
 0x2e9   : > { %v1492_v19 = vmul.f32 %v1916_v14, %v1488_v17  ;;  %v1485_v20 = vmul.f32 %v1918_v18, %v1477_v8 }
 0x2eb   : > { %1506 = vperm.xlu0 %1887, %v1492_v19   ;;  %v1489_v21 = vsub.f32 2.0, %v1485_v20 }
 0x2ec   : > { %v1920_v22 = vpop.eup %1919 }
 0x2ed   : > { %v1493_v23 = vmul.f32 %v1918_v18, %v1489_v21  ;;  %v1486_v24 = vmul.f32 %v1920_v22, %v1478_v12 }
 0x2ef   : > { %1511 = vperm.xlu1 %1888, %v1493_v23   ;;  %v1490_v26 = vsub.f32 2.0, %v1486_v24 }
 0x2f1   : > { %v1494_v27 = vmul.f32 %v1920_v22, %v1490_v26 }
 0x2f3   : > { %1516 = vperm.xlu0 %1887, %v1494_v27  }
 0x30e   : > { %v1229_v37 = vpop.f32.mrb[4].mxu0 }
 0x30f   : > { %v1452_v29 = vadd.f32 %v1229_v37, %v1156_v32  ;;  %v1824_v30 = vpop.f32.mrb[5].mxu0 }
 0x311   : > { %1456 = vst.msk [vmem:[#allocation4] sm:$0xff] %vm484_vm0, %v1452_v29 }
 0x312   : > { %v1302_v41 = vpop.f32.mrb[4].mxu1 }
 0x313   : > { %v1453_v42 = vadd.f32 %v1302_v41, %v1157_v38  ;;  %v1829_v43 = vpop.f32.mrb[5].mxu1 }
 0x315   : > { %1457 = vst.msk [vmem:[#allocation4 + $0x8] sm:$0xff] %vm484_vm0, %v1453_v42 }
 0x316   : > { %v1375_v49 = vpop.f32.mrb[6].mxu0 }
 0x317   : > { %v1454_v51 = vadd.f32 %v1375_v49, %v1158_v45  ;;  %v1834_v52 = vpop.f32.mrb[7].mxu0 }
 0x318   : > { %v1495_v59 = vld [vmem:[#allocation4] sm:$0xff] }
 0x319   : > { %1458 = vst.msk [vmem:[#allocation4 + $0x10] sm:$0xff] %vm484_vm0, %v1454_v51 }
 0x31a   : > { %v1448_v50 = vpop.f32.mrb[6].mxu1 }
 0x31b   : > { %v1455_v53 = vadd.f32 %v1448_v50, %v1159_v44  ;;  %v1839_v54 = vpop.f32.mrb[7].mxu1 }
 0x31c   : > { %v1496_v61 = vld [vmem:[#allocation4 + $0x8] sm:$0xff] }
 0x31d   : > { %1459 = vst.msk [vmem:[#allocation4 + $0x18] sm:$0xff] %vm484_vm0, %v1455_v53 }
 0x320   : > { %v1497_v58 = vld [vmem:[#allocation4 + $0x10] sm:$0xff] }
 0x324   : > { %v1498_v63 = vld [vmem:[#allocation4 + $0x18] sm:$0xff] }
 0x366   : > { %v1502_v56 = vpop.permute.xlu1 %1501 }
 0x367   : > { %v1519_v60 = vmul.f32 %v1502_v56, %v1495_v59 }
 0x36a   : > { %v1507_v48 = vpop.permute.xlu0 %1506 }
 0x36b   : > { %v1520_v0 = vmul.f32 %v1507_v48, %v1496_v61 }
 0x36e   : > { %v1512_v57 = vpop.permute.xlu1 %1511 }
 0x36f   : > { %v1521_v55 = vmul.f32 %v1512_v57, %v1497_v58 }
 0x371   : > { %v1523_v1 = vcombine.low %v1519_v60, %v1521_v55  ;;  %v1524_v2 = vcombine.high %v1519_v60, %v1521_v55 }
 0x372   : > { %v1517_v62 = vpop.permute.xlu0 %1516 }
 0x373   : > { %v1522_v3 = vmul.f32 %v1517_v62, %v1498_v63  ;;  %v1531_v6 = vrot.slane %v1523_v1, %v2070_v33  ;;  %v1538_v7 = vrot.slane %v1524_v2, %v2070_v33 }
 0x375   : > { %v1539_v4 = vcombine.low %v1520_v0, %v1522_v3  ;;  %v1540_v5 = vcombine.high %v1520_v0, %v1522_v3 }
 0x377   : > { %v1547_v8 = vrot.slane %v1539_v4, %v2070_v33  ;;  %v1554_v9 = vrot.slane %v1540_v5, %v2070_v33 }
 0x379   : > { %v1555_v10 = vcombine.low %v1531_v6, %v1547_v8  ;;  %v1556_v11 = vcombine.high %v1531_v6, %v1547_v8  ;;  %v1571_v12 = vcombine.low %v1538_v7, %v1554_v9  ;;  %v1572_v13 = vcombine.high %v1538_v7, %v1554_v9 }
 0x37b   : > { %v1563_v14 = vrot.slane %v1555_v10, %v2074_v40  ;;  %v1570_v15 = vrot.slane %v1556_v11, %v2074_v40  ;;  %v1579_v16 = vrot.slane %v1571_v12, %v2074_v40  ;;  %v1586_v17 = vrot.slane %v1572_v13, %v2074_v40 }
 0x37d   : > { %v1587_v18 = vcombine.high %v1563_v14, %v1961_v25  ;;  %v1588_v33 = vcombine.high %v1570_v15, %v1961_v25  ;;  %v1589_v19 = vcombine.high %v1579_v16, %v1961_v25  ;;  %v1590_v20 = vcombine.high %v1586_v17, %v1961_v25  ;;  %1592 = vst.msk [vmem:[%s469_s30] sm:$0xf] %vm1591_vm12, %v1563_v14 }
 0x37e   : > { %1594 = vst.msk [vmem:[%s469_s30 + $0x8] sm:$0xf] %vm1591_vm12, %v1570_v15  ;;  %1596 = vst.msk [vmem:[%s469_s30 + $0x10] sm:$0xf] %vm1591_vm12, %v1579_v16 }
 0x37f   : > { %1598 = vst.msk [vmem:[%s469_s30 + $0x18] sm:$0xf] %vm1591_vm12, %v1586_v17  ;;  %1593 = vst.msk [vmem:[%s469_s30 + $0x4] sm:$0xf] %vm1591_vm12, %v1587_v18 }
 0x380   : > { %1595 = vst.msk [vmem:[%s469_s30 + $0xc] sm:$0xf] %vm1591_vm12, %v1588_v33  ;;  %1597 = vst.msk [vmem:[%s469_s30 + $0x14] sm:$0xf] %vm1591_vm12, %v1589_v19 }
 0x381   : > { %1599 = vst.msk [vmem:[%s469_s30 + $0x1c] sm:$0xf] %vm1591_vm12, %v1590_v20 }
 0x382 PF: > { %s13_s16 = sadd.s32 1, %s1959_s16   ;;  %s2267_s12 = smov %s1947_s13 }
 0x383   : > { %p10_p10 = scmp.ge.s32.totalorder %s13_s16, 4   ;;  %s2268_s13 = smov %s2026_s21 }
 0x384   : > { %s2269_s14 = smov %s1955_s15  ;;  %s2270_s15 = smov %s2272_s17 }
 0x385   :  { %12 = sbr.rel (!%p10_p10) target bundleno = 3 (0x3), region = 214 }

</bundles_post_ra>
